<compile_context>
chip_gen: v7x
topology: tpu7x:2x2x1
jax: 0.10.0
libtpu: 0.0.40
codegen_flags: <defaults>
</compile_context>

<pallas_src>
import functools

import numpy as np
import jax
import jax.numpy as jnp
from jax import lax
from jax.experimental import pallas as pl
from jax.experimental.pallas import tpu as pltpu

H = 256          # input_dim hard-coded in CorrelationAttentivePooling.__init__
NHEADS = 4       # self.nheads
HEADS_PAD = 128  # head projection padded to one full lane width (padding masked in LSE)

# Flat row-major indices of the strict upper triangle (offset=1), compile-time const.
# np.triu_indices ordering matches torch.triu_indices (row-major).
_IU0, _IU1 = np.triu_indices(H, k=1)
_TRIU_FLAT_IDX = jnp.asarray((_IU0 * H + _IU1).astype(np.int32))

# Conservative per-step VMEM budget used to size the batch block.  Keeps the
# kernel comfortably inside v7x's 64 MiB physical VMEM and works on v5e/v6e once
# the scoped limit is raised explicitly (vmem_limit_bytes below).
_VMEM_BUDGET_BYTES = 32 << 20


def _corr_attentive_pool_kernel(len_ref, x_ref, wa_ref, ba_ref, w_ref, b_ref,
                                corr_ref, logits_ref, *, bb, t, n_valid,
                                compute_dtype):
    g = pl.program_id(0)

    # ---- attention matmuls on the whole (bb*T, H) row slab (MXU sees >=128 rows) ----
    x_c = x_ref[...].astype(compute_dtype)          # no-op when stored dtype == compute dtype
    # Hidden activation produced directly in compute_dtype: f32 accumulation,
    # fused bias + ReLU + cast, no long-lived f32 (bb*T, H) intermediate.
    h = jnp.maximum(
        jnp.dot(x_c, wa_ref[...], preferred_element_type=jnp.float32) + ba_ref[...],
        0.0).astype(compute_dtype)
    # Lane-padded head logits written straight into a VMEM scratch.  Padded lanes
    # carry bias -1e30 so the per-row logsumexp ignores them — this relies on the
    # f32 accumulation being pinned here.
    logits_ref[...] = (
        jnp.dot(h, w_ref[...], preferred_element_type=jnp.float32) + b_ref[...])

    iota_t = lax.broadcasted_iota(jnp.int32, (t, 1), 0)

    # ---- per-utterance softmax / centering / correlation ----
    def per_utt(b, carry):
        @pl.when(g * bb + b < n_valid)     # skip batch-padding rows of the last block
        def _():
            row0 = pl.multiple_of(b * t, 8)

            # logsumexp over heads, read back from the logits scratch (ref slice).
            lgt = logits_ref[pl.ds(row0, t), :]                          # (T, 128) f32
            m = jnp.max(lgt, axis=-1, keepdims=True)
            lse = m + jnp.log(jnp.sum(jnp.exp(lgt - m), axis=-1, keepdims=True))

            # Additive 0/1 length mask matches torch: att_logits = bool_mask + lse.
            seq_len = len_ref[g * bb + b]                                # scalar from SMEM
            mask_f = (iota_t < seq_len).astype(jnp.float32)              # (T, 1)
            att_logits = mask_f + lse
            amax = jnp.max(att_logits, axis=0, keepdims=True)
            e = jnp.exp(att_logits - amax)
            att_w = e * pl.reciprocal(jnp.sum(e, axis=0, keepdims=True),
                                      approx=True)                      # (T, 1)

            # Ref-sliced feature rows for this utterance (no slab-wide value kept live).
            x = x_ref[pl.ds(row0, t), :].astype(jnp.float32)             # (T, H)
            sap = jnp.sum(x * att_w, axis=0, keepdims=True)              # (1, H)
            xc = x - sap

            # corr[k,l] = sum_t w_t xc[t,k] xc[t,l] / (s_k s_l), s_k = sqrt(diag_k + 1e-9)
            # Columns pre-scaled by 1/s so one MXU matmul yields the normalized corr.
            diag = jnp.sum(att_w * xc * xc, axis=0, keepdims=True)       # (1, H)
            inv_s = lax.rsqrt(diag + 1e-9)
            y32 = xc * inv_s                                             # (T, H)
            y = y32.astype(compute_dtype)
            wy = (att_w * y32).astype(compute_dtype)
            corr = lax.dot_general(wy, y, (((0,), (0,)), ((), ())),
                                   preferred_element_type=jnp.float32)   # (H, H)
            corr_ref[b] = corr
        return carry

    # fori_loop (not a static Python unroll) keeps vreg live ranges flat at large bb.
    lax.fori_loop(0, bb, per_utt, None, unroll=2 if bb % 2 == 0 else 1)


def prepare_params(params, compute_dtype=jnp.bfloat16):
    """One-time weight prep (transpose, head-dim lane padding, compute-dtype cast),
    hoisted out of the per-call path.  Biases stay f32 (added to f32 accumulators)."""
    wa_t = jnp.asarray(params["wa_weight"], jnp.float32).T               # (H, H): x @ Wa^T
    ba = jnp.asarray(params["wa_bias"], jnp.float32).reshape(1, H)
    w_t = jnp.asarray(params["w_weight"], jnp.float32).T                 # (H, NHEADS)
    w_pad = jnp.zeros((H, HEADS_PAD), jnp.float32).at[:, :NHEADS].set(w_t)
    b_pad = jnp.full((1, HEADS_PAD), -1e30, jnp.float32)
    b_pad = b_pad.at[0, :NHEADS].set(jnp.asarray(params["w_bias"], jnp.float32))
    return {"wa_t": wa_t.astype(compute_dtype), "ba": ba,
            "w_pad": w_pad.astype(compute_dtype), "b_pad": b_pad}


def _vmem_bytes_estimate(bb, t, in_itemsize, compute_itemsize):
    slab = 2 * bb * t * H * in_itemsize                 # double-buffered feature block
    logits = bb * t * HEADS_PAD * 4                     # logits scratch (single copy)
    outb = 2 * bb * H * H * 4                           # double-buffered corr output block
    wts = 2 * (H * H + H * HEADS_PAD) * compute_itemsize + 2 * (H + HEADS_PAD) * 4
    return slab + logits + outb + wts + (2 << 20)       # + per-utterance temporaries slack


def _pick_block_b(B, t, in_itemsize, compute_itemsize, block_b):
    bb = max(1, min(block_b, B))
    if B > 1:
        bb = min(bb, -(-B // 2))     # >= 2 grid steps so both v7x TensorCores get work
    while bb > 1 and _vmem_bytes_estimate(bb, t, in_itemsize,
                                          compute_itemsize) > _VMEM_BUDGET_BYTES:
        bb -= 1
    return bb


def correlation_attentive_pooling(feature_BxTxH, features_len, prepared, *, block_b=8):
    B, T, Hd = feature_BxTxH.shape
    assert Hd == H
    assert T % 8 == 0, "row-slab matmul / ref-slicing path assumes T is a multiple of 8"

    compute_dtype = prepared["wa_t"].dtype              # static metadata under jit
    in_itemsize = jnp.dtype(feature_BxTxH.dtype).itemsize
    compute_itemsize = jnp.dtype(compute_dtype).itemsize

    bb = _pick_block_b(B, T, in_itemsize, compute_itemsize, block_b)
    grid_steps = -(-B // bb)

    # Only the tiny length vector is padded; the feature tensor is consumed in its
    # stored dtype with no host-side pad/astype copy (the reshape below is a free
    # metadata op).  The partial last feature/output block is handled by Pallas
    # (clamped input DMA, masked output writeback) plus the in-kernel guard.
    lens = features_len.astype(jnp.int32)
    if grid_steps * bb != B:
        lens = jnp.pad(lens, (0, grid_steps * bb - B))
    feature_2d = feature_BxTxH.reshape(B * T, H)

    est = _vmem_bytes_estimate(bb, T, in_itemsize, compute_itemsize)
    vmem_limit = int(min(max(est + est // 4 + (4 << 20), 16 << 20), 112 << 20))

    kernel = functools.partial(_corr_attentive_pool_kernel, bb=bb, t=T,
                               n_valid=B, compute_dtype=compute_dtype)

    corr = pl.pallas_call(
        kernel,
        out_shape=jax.ShapeDtypeStruct((B, H, H), jnp.float32),
        grid_spec=pltpu.PrefetchScalarGridSpec(
            num_scalar_prefetch=1,                          # features_len -> SMEM
            grid=(grid_steps,),
            in_specs=[
                pl.BlockSpec((bb * T, H), lambda g, lens: (g, 0)),       # feature slab (stored dtype)
                pl.BlockSpec((H, H), lambda g, lens: (0, 0)),            # Wa^T (compute dtype)
                pl.BlockSpec((1, H), lambda g, lens: (0, 0)),            # Wa bias (f32)
                pl.BlockSpec((H, HEADS_PAD), lambda g, lens: (0, 0)),    # W^T, lane-padded (compute dtype)
                pl.BlockSpec((1, HEADS_PAD), lambda g, lens: (0, 0)),    # W bias (pad = -1e30, f32)
            ],
            out_specs=pl.BlockSpec((bb, H, H), lambda g, lens: (g, 0, 0)),
            scratch_shapes=[pltpu.VMEM((bb * T, HEADS_PAD), jnp.float32)],
        ),
        compiler_params=pltpu.CompilerParams(
            dimension_semantics=("parallel",),
            vmem_limit_bytes=vmem_limit),
    )(lens, feature_2d, prepared["wa_t"], prepared["ba"],
      prepared["w_pad"], prepared["b_pad"])

    # Strict upper triangle (offset=1) via a single flat take with constant indices.
    agg_vec = jnp.take(corr.reshape(B, H * H), _TRIU_FLAT_IDX, axis=1)
    return agg_vec, jnp.ones((B,), dtype=jnp.int32)


def _reference(feature, features_len, params):
    """Pure-JAX reference mirroring the PyTorch forward, for sanity checking."""
    B, T, _ = feature.shape
    mask = (jnp.arange(T)[None, :] < features_len[:, None]).astype(jnp.float32)
    h = jnp.maximum(feature @ params["wa_weight"].T + params["wa_bias"], 0.0)
    logits = h @ params["w_weight"].T + params["w_bias"]            # (B, T, 4)
    lse = jax.scipy.special.logsumexp(logits, axis=-1)              # (B, T)
    att_logits = mask + lse
    att_w = jax.nn.softmax(att_logits, axis=-1)[..., None]          # (B, T, 1)
    sap = jnp.sum(feature * att_w, axis=1)                          # (B, H)
    iu0, iu1 = np.triu_indices(H, k=1)
    outs = []
    for i in range(B):
        x = feature[i] - sap[i]
        corr = jnp.einsum('jk,jl->kl', att_w[i] * x, x)
        s = jnp.sqrt(jnp.diagonal(corr) + 1e-9)
        corr = corr / jnp.outer(s, s)
        outs.append(corr[iu0, iu1])
    return jnp.stack(outs), jnp.ones((B,), dtype=jnp.int32)


if __name__ == "__main__":
    key = jax.random.PRNGKey(0)
    kx, k1, k2, k3, k4 = jax.random.split(key, 5)

    # B=5 with block_b=4 -> bb=3: a 2-step parallel grid with a partial last block
    # (exercises the clamped DMA / masked writeback / pl.when guard path).
    B, T = 5, 32
    feature = jax.random.normal(kx, (B, T, H), dtype=jnp.float32)
    features_len = jnp.array([32, 20, 7, 32, 15], dtype=jnp.int32)

    params = {
        "wa_weight": jax.random.normal(k1, (H, H), dtype=jnp.float32) * 0.05,
        "wa_bias": jax.random.normal(k2, (H,), dtype=jnp.float32) * 0.05,
        "w_weight": jax.random.normal(k3, (NHEADS, H), dtype=jnp.float32) * 0.05,
        "w_bias": jax.random.normal(k4, (NHEADS,), dtype=jnp.float32) * 0.05,
    }
    prepared_f32 = prepare_params(params, compute_dtype=jnp.float32)
    prepared_bf16 = prepare_params(params, compute_dtype=jnp.bfloat16)

    run = jax.jit(functools.partial(correlation_attentive_pooling, block_b=4))

    # Validation path: f32 storage + f32 MXU compute.
    out_f32, lens_out = run(feature, features_len, prepared_f32)
    # Fast path: bf16 feature storage (half the slab DMA/VMEM) + bf16 MXU compute.
    out_bf16, _ = run(feature.astype(jnp.bfloat16), features_len, prepared_bf16)
    jax.block_until_ready((out_f32, out_bf16))

    ref_out, _ = _reference(feature, features_len, params)
    assert out_f32.shape == (B, H * (H - 1) // 2)
    assert lens_out.shape == (B,)
    # f32 path: tight check (approx-reciprocal softmax denom costs a few ulps).
    err_f32 = float(jnp.max(jnp.abs(out_f32 - ref_out)))
    assert jnp.allclose(out_f32, ref_out, rtol=5e-3, atol=5e-3), err_f32
    # bf16 storage + bf16 MXU inputs (f32 accumulation): normalized correlations
    # in [-1, 1], mixed-precision tolerance.
    err_bf16 = float(jnp.max(jnp.abs(out_bf16 - ref_out)))
    assert jnp.allclose(out_bf16, ref_out, rtol=7e-2, atol=7e-2), err_bf16

    print("KERNEL_OK")
</pallas_src>

<mosaic_0001>
module attributes {stable_mosaic.version = 11 : i64} {
  func.func private @main(%arg0: i32) attributes {dimension_semantics = [#tpu.dimension_semantics<core_parallel>], iteration_bounds = array<i64: 2>, tpu.core_type = #tpu.core_type<sc_scalar_subcore>, window_params = []} {
    return
  }
}

module attributes {stable_mosaic.version = 11 : i64} {
  func.func private @main(%arg0: i32) attributes {dimension_semantics = [#tpu.dimension_semantics<core_parallel>], iteration_bounds = array<i64: 2>, tpu.core_type = #tpu.core_type<sc_scalar_subcore>, window_params = []} {
    return
  }
}

module attributes {stable_mosaic.version = 11 : i64} {
  func.func @_corr_attentive_pool_kernel(%arg0: i32, %arg1: memref<6xi32, #tpu.memory_space<smem>>, %arg2: memref<96x256xf32, #tpu.memory_space<vmem>>, %arg3: memref<256x256xf32, #tpu.memory_space<vmem>>, %arg4: memref<1x256xf32, #tpu.memory_space<vmem>>, %arg5: memref<256x128xf32, #tpu.memory_space<vmem>>, %arg6: memref<1x128xf32, #tpu.memory_space<vmem>>, %arg7: memref<3x256x256xf32, #tpu.memory_space<vmem>>, %arg8: memref<96x128xf32, #tpu.memory_space<vmem>>) attributes {dimension_semantics = [#tpu.dimension_semantics<parallel>], iteration_bounds = array<i64: 2>, scalar_prefetch = 1 : i64, scratch_operands = 1 : i64, tpu.core_type = #tpu.core_type<tc>, window_params = [{transform_indices = @transform_0, window_bounds = array<i64: 96, 256>}, {pipeline_mode = #tpu.pipeline_mode<synchronous>, transform_indices = @transform_1, window_bounds = array<i64: 256, 256>}, {pipeline_mode = #tpu.pipeline_mode<synchronous>, transform_indices = @transform_2, window_bounds = array<i64: 1, 256>}, {pipeline_mode = #tpu.pipeline_mode<synchronous>, transform_indices = @transform_3, window_bounds = array<i64: 256, 128>}, {pipeline_mode = #tpu.pipeline_mode<synchronous>, transform_indices = @transform_4, window_bounds = array<i64: 1, 128>}, {transform_indices = @transform_5, window_bounds = array<i64: 3, 256, 256>}]} {
    %c0 = arith.constant 0 : index
    %c0_0 = arith.constant 0 : index
    %0 = vector.load %arg2[%c0, %c0_0] : memref<96x256xf32, #tpu.memory_space<vmem>>, vector<96x256xf32>
    %c0_1 = arith.constant 0 : index
    %c0_2 = arith.constant 0 : index
    %1 = vector.load %arg3[%c0_1, %c0_2] : memref<256x256xf32, #tpu.memory_space<vmem>>, vector<256x256xf32>
    %cst = arith.constant dense<0.000000e+00> : vector<96x256xf32>
    %2 = tpu.matmul %0, %1, %cst {dimension_numbers = #tpu.dot_dimension_numbers<[1], [0], [0], [1], [0, 0, 1, 1], [], []>} : vector<96x256xf32>, vector<256x256xf32>, vector<96x256xf32> -> vector<96x256xf32>
    %c0_3 = arith.constant 0 : index
    %c0_4 = arith.constant 0 : index
    %3 = vector.load %arg4[%c0_3, %c0_4] : memref<1x256xf32, #tpu.memory_space<vmem>>, vector<1x256xf32>
    %4 = vector.broadcast %3 : vector<1x256xf32> to vector<96x256xf32>
    %5 = arith.addf %2, %4 : vector<96x256xf32>
    %cst_5 = arith.constant 0.000000e+00 : f32
    %6 = vector.broadcast %cst_5 : f32 to vector<96x256xf32>
    %7 = arith.maximumf %5, %6 : vector<96x256xf32>
    %c0_6 = arith.constant 0 : index
    %c0_7 = arith.constant 0 : index
    %8 = vector.load %arg5[%c0_6, %c0_7] : memref<256x128xf32, #tpu.memory_space<vmem>>, vector<256x128xf32>
    %cst_8 = arith.constant dense<0.000000e+00> : vector<96x128xf32>
    %9 = tpu.matmul %7, %8, %cst_8 {dimension_numbers = #tpu.dot_dimension_numbers<[1], [0], [0], [1], [0, 0, 1, 1], [], []>} : vector<96x256xf32>, vector<256x128xf32>, vector<96x128xf32> -> vector<96x128xf32>
    %c0_9 = arith.constant 0 : index
    %c0_10 = arith.constant 0 : index
    %10 = vector.load %arg6[%c0_9, %c0_10] : memref<1x128xf32, #tpu.memory_space<vmem>>, vector<1x128xf32>
    %11 = vector.broadcast %10 : vector<1x128xf32> to vector<96x128xf32>
    %12 = arith.addf %9, %11 : vector<96x128xf32>
    %c0_11 = arith.constant 0 : index
    %c0_12 = arith.constant 0 : index
    %13 = vector.load %arg8[%c0_11, %c0_12] : memref<96x128xf32, #tpu.memory_space<vmem>>, vector<96x128xf32>
    tpu.vector_store %arg8[%c0_11, %c0_12], %12 {strides = array<i32>} : memref<96x128xf32, #tpu.memory_space<vmem>>, vector<96x128xf32>,
    %14 = tpu.iota {dimensions = array<i32: 0>} : vector<32x1xi32>
    %c0_i32 = arith.constant 0 : i32
    %c3_i32 = arith.constant 3 : i32
    %15 = arith.addi %c0_i32, %c3_i32 : i32
    %c1_i32 = arith.constant 1 : i32
    scf.for %arg9 = %c0_i32 to %15 step %c1_i32  : i32 {
      %c3_i32_14 = arith.constant 3 : i32
      %16 = arith.muli %arg0, %c3_i32_14 : i32
      %17 = arith.addi %16, %arg9 : i32
      %c5_i32 = arith.constant 5 : i32
      %18 = arith.cmpi slt, %17, %c5_i32 : i32
      %19 = arith.extui %18 : i1 to i32
      %c0_i32_15 = arith.constant 0 : i32
      %20 = arith.cmpi ne, %19, %c0_i32_15 : i32
      scf.if %20 {
        %c32_i32 = arith.constant 32 : i32
        %21 = arith.muli %arg9, %c32_i32 : i32
        %22 = tpu.assume_multiple %21, 8 : i32
        %23 = arith.index_cast %22 : i32 to index
        %c0_16 = arith.constant 0 : index
        %24 = vector.load %arg8[%23, %c0_16] : memref<96x128xf32, #tpu.memory_space<vmem>>, vector<32x128xf32>
        %cst_17 = arith.constant dense<0xFF800000> : vector<32xf32>
        %25 = vector.multi_reduction <maximumf>, %24, %cst_17 [1] : vector<32x128xf32> to vector<32xf32>
        %26 = vector.shape_cast %25 : vector<32xf32> to vector<32x1xf32>
        %27 = vector.broadcast %26 : vector<32x1xf32> to vector<32x128xf32>
        %28 = arith.subf %24, %27 : vector<32x128xf32>
        %29 = math.exp %28 : vector<32x128xf32>
        %cst_18 = arith.constant dense<0.000000e+00> : vector<32xf32>
        %30 = vector.multi_reduction <add>, %29, %cst_18 [1] : vector<32x128xf32> to vector<32xf32>
        %31 = vector.shape_cast %30 : vector<32xf32> to vector<32x1xf32>
        %32 = math.log %31 : vector<32x1xf32>
        %33 = arith.addf %26, %32 : vector<32x1xf32>
        %c3_i32_19 = arith.constant 3 : i32
        %34 = arith.muli %arg0, %c3_i32_19 : i32
        %35 = arith.addi %34, %arg9 : i32
        %36 = arith.index_cast %35 : i32 to index
        %37 = memref.load %arg1[%36] : memref<6xi32, #tpu.memory_space<smem>>
        %38 = vector.broadcast %37 : i32 to vector<32x1xi32>
        %39 = arith.cmpi slt, %14, %38 : vector<32x1xi32>
        %40 = arith.extui %39 : vector<32x1xi1> to vector<32x1xi32>
        %41 = arith.sitofp %40 : vector<32x1xi32> to vector<32x1xf32>
        %42 = arith.addf %41, %33 : vector<32x1xf32>
        %cst_20 = arith.constant dense<0xFF800000> : vector<1xf32>
        %43 = vector.multi_reduction <maximumf>, %42, %cst_20 [0] : vector<32x1xf32> to vector<1xf32>
        %44 = vector.shape_cast %43 : vector<1xf32> to vector<1x1xf32>
        %45 = vector.broadcast %44 : vector<1x1xf32> to vector<32x1xf32>
        %46 = arith.subf %42, %45 : vector<32x1xf32>
        %47 = math.exp %46 : vector<32x1xf32>
        %cst_21 = arith.constant dense<0.000000e+00> : vector<1xf32>
        %48 = vector.multi_reduction <add>, %47, %cst_21 [0] : vector<32x1xf32> to vector<1xf32>
        %49 = vector.shape_cast %48 : vector<1xf32> to vector<1x1xf32>
        %50 = tpu.reciprocal %49 {approx = true} : vector<1x1xf32> -> vector<1x1xf32>
        %51 = vector.broadcast %50 : vector<1x1xf32> to vector<32x1xf32>
        %52 = arith.mulf %47, %51 : vector<32x1xf32>
        %53 = arith.index_cast %22 : i32 to index
        %c0_22 = arith.constant 0 : index
        %54 = vector.load %arg2[%53, %c0_22] : memref<96x256xf32, #tpu.memory_space<vmem>>, vector<32x256xf32>
        %55 = vector.broadcast %52 : vector<32x1xf32> to vector<32x256xf32>
        %56 = arith.mulf %54, %55 : vector<32x256xf32>
        %cst_23 = arith.constant dense<0.000000e+00> : vector<256xf32>
        %57 = vector.multi_reduction <add>, %56, %cst_23 [0] : vector<32x256xf32> to vector<256xf32>
        %58 = vector.shape_cast %57 : vector<256xf32> to vector<1x256xf32>
        %59 = vector.broadcast %58 : vector<1x256xf32> to vector<32x256xf32>
        %60 = arith.subf %54, %59 : vector<32x256xf32>
        %61 = vector.broadcast %52 : vector<32x1xf32> to vector<32x256xf32>
        %62 = arith.mulf %61, %60 : vector<32x256xf32>
        %63 = arith.mulf %62, %60 : vector<32x256xf32>
        %cst_24 = arith.constant dense<0.000000e+00> : vector<256xf32>
        %64 = vector.multi_reduction <add>, %63, %cst_24 [0] : vector<32x256xf32> to vector<256xf32>
        %65 = vector.shape_cast %64 : vector<256xf32> to vector<1x256xf32>
        %cst_25 = arith.constant 9.99999971E-10 : f32
        %66 = vector.broadcast %cst_25 : f32 to vector<1x256xf32>
        %67 = arith.addf %65, %66 : vector<1x256xf32>
        %68 = math.rsqrt %67 : vector<1x256xf32>
        %69 = vector.broadcast %68 : vector<1x256xf32> to vector<32x256xf32>
        %70 = arith.mulf %60, %69 : vector<32x256xf32>
        %71 = vector.broadcast %52 : vector<32x1xf32> to vector<32x256xf32>
        %72 = arith.mulf %71, %70 : vector<32x256xf32>
        %cst_26 = arith.constant dense<0.000000e+00> : vector<256x256xf32>
        %73 = tpu.matmul %72, %70, %cst_26 {dimension_numbers = #tpu.dot_dimension_numbers<[0], [0], [1], [1], [0, 1, 1, 1], [], []>} : vector<32x256xf32>, vector<32x256xf32>, vector<256x256xf32> -> vector<256x256xf32>
        %74 = arith.index_cast %arg9 : i32 to index
        %c0_27 = arith.constant 0 : index
        %c0_28 = arith.constant 0 : index
        %75 = vector.load %arg7[%74, %c0_27, %c0_28] : memref<3x256x256xf32, #tpu.memory_space<vmem>>, vector<1x256x256xf32>
        %76 = vector.shape_cast %75 : vector<1x256x256xf32> to vector<256x256xf32>
        %77 = vector.shape_cast %73 : vector<256x256xf32> to vector<1x256x256xf32>
        tpu.vector_store %arg7[%74, %c0_27, %c0_28], %77 {strides = array<i32>} : memref<3x256x256xf32, #tpu.memory_space<vmem>>, vector<1x256x256xf32>,
      } else {
      }
    }
    %c3_i32_13 = arith.constant 3 : i32
    return
  }
  func.func @transform_0(%arg0: i32, %arg1: memref<6xi32, #tpu.memory_space<smem>>) -> (i32, i32) {
    %c0_i32 = arith.constant 0 : i32
    %c0_i32_0 = arith.constant 0 : i32
    return %arg0, %c0_i32 : i32, i32
  }
  func.func @transform_1(%arg0: i32, %arg1: memref<6xi32, #tpu.memory_space<smem>>) -> (i32, i32) {
    %c0_i32 = arith.constant 0 : i32
    %c0_i32_0 = arith.constant 0 : i32
    %c0_i32_1 = arith.constant 0 : i32
    return %c0_i32, %c0_i32_0 : i32, i32
  }
  func.func @transform_2(%arg0: i32, %arg1: memref<6xi32, #tpu.memory_space<smem>>) -> (i32, i32) {
    %c0_i32 = arith.constant 0 : i32
    %c0_i32_0 = arith.constant 0 : i32
    %c0_i32_1 = arith.constant 0 : i32
    return %c0_i32, %c0_i32_0 : i32, i32
  }
  func.func @transform_3(%arg0: i32, %arg1: memref<6xi32, #tpu.memory_space<smem>>) -> (i32, i32) {
    %c0_i32 = arith.constant 0 : i32
    %c0_i32_0 = arith.constant 0 : i32
    %c0_i32_1 = arith.constant 0 : i32
    return %c0_i32, %c0_i32_0 : i32, i32
  }
  func.func @transform_4(%arg0: i32, %arg1: memref<6xi32, #tpu.memory_space<smem>>) -> (i32, i32) {
    %c0_i32 = arith.constant 0 : i32
    %c0_i32_0 = arith.constant 0 : i32
    %c0_i32_1 = arith.constant 0 : i32
    return %c0_i32, %c0_i32_0 : i32, i32
  }
  func.func @transform_5(%arg0: i32, %arg1: memref<6xi32, #tpu.memory_space<smem>>) -> (i32, i32, i32) {
    %c0_i32 = arith.constant 0 : i32
    %c0_i32_0 = arith.constant 0 : i32
    %c0_i32_1 = arith.constant 0 : i32
    return %arg0, %c0_i32, %c0_i32_0 : i32, i32, i32
  }
}

</mosaic_0001>

<bundles_post_ra>
// kernel: correlation_attentive_pooling.1
= control target key start
LH: loop header
LB: loop body
LE: loop exit
PB: predicated region body
PF: predicated region fallthrough
CT: control target
= control target key end

     0   :  { %s3288_s0 = inlined_call_operand.vmem [shape: s32[6], index: 0, kind: input, shape index: {}]   ;;  %s3289_s1 = inlined_call_operand.hbm [shape: f32[160,256], index: 1, kind: input, shape index: {}]   ;;  %s3290_s2 = inlined_call_operand.hbm [shape: f32[256,256], index: 2, kind: input, shape index: {}]   ;;  %s3291_s3 = inlined_call_operand.hbm [shape: f32[1,256], index: 3, kind: input, shape index: {}]   ;;  %s3292_s4 = inlined_call_operand.hbm [shape: f32[256,128], index: 4, kind: input, shape index: {}]   ;;  %s3293_s5 = inlined_call_operand.hbm [shape: f32[1,128], index: 5, kind: input, shape index: {}]   ;;  %s3294_s6 = inlined_call_operand.vmem [shape: f32[5,256,256], index: 6, kind: output, shape index: {}]  }
   0x1   :  { %3298 = sst [smem:[#allocation18_spill]] %s3290_s2  ;;  %s11_s23 = sshll.u32 %s3288_s0, 4  ;;  %s12_s23 = int_to_ptr.vmem [resolvable:$true] %s11_s23 }
   0x2   :  { %s2263_s24 = scalar_lea.vmem %s12_s23, 16  ;;  %p2268_p1 = scmp.lt.s32.totalorder %s12_s23, %s12_s23 }
   0x3   :  { %p2264_p0 = scmp.ne.s32.totalorder %s12_s23, %s2263_s24  ;;  %p2269_p2 = scmp.lt.s32.totalorder %s2263_s24, %s2263_s24 }
   0x5   :  { %p2270_p3 = por %p2269_p2, %p2268_p1 }
   0x7   :  { %p2271_p4 = pnand %p2270_p3, %p2264_p0 }
   0x9   :  { %2274 = shalt.err (!%p2271_p4)  }
   0xa   :  { %s2533_s25 = smov [#allocation4]  }
   0xb   :  { %14 = dma.vmem_to_smem %s12_s23, 16, %s2533_s25, [#allocation3] }
   0xc   :  { %2467 = dma.done.wait [#allocation3], 16 }
   0xd   :  { %2468 = vsyncadd [#allocation3], 4294967280 }
   0xe   :  { %16 = sfence }
   0xf   :  { %17 = vsyncpa [#allocation6], 0 }
  0x10   :  { %19 = vsyncpa [#allocation6 + $0x1], 0 }
  0x11   :  { %20 = vsyncpa [#allocation8], 0 }
  0x12   :  { %21 = vsyncpa [#allocation11], 0  ;;  %s2584_s26 = smov 0   ;;  %s2586_s0 = smov 0  }
  0x13   :  { %s2588_s27 = smov 0   ;;  %s2590_s28 = smov 0  }
  0x14 LB: > { %s2603_s29 = sadd.s32 4294967295, %s2495_s28   ;;  %s2606_s30 = sadd.s32 1, %s2495_s28   ;;  %s2495_s28 = sphi %s2590_s28, %s3322_s28   ;;  %s2491_s27 = sphi %s2588_s27, %s3321_s27   ;;  %s2487_s0 = sphi %s2586_s0, %s3320_s0   ;;  %s2483_s26 = sphi %s2584_s26, %s3319_s26  }
  0x15   : > { %s31_s7 = ssub.s32 %s2495_s28, %s2606_s30  ;;  %s34_s8 = sadd.s32 1, %s2491_s27 }
  0x16   : > { %p32_p5 = scmp.eq.s32.totalorder %s31_s7, 0  ;;  %p41_p6 = scmp.ne.s32.totalorder %s2491_s27, %s2487_s0 }
  0x17   : > { %p42_p7 = scmp.eq.s32.totalorder %s2495_s28, 0  ;;  %p47_p8 = scmp.ne.s32.totalorder %s2487_s0, %s2483_s26 }
  0x18   : > { %s2616_s9 = scalar_select %p32_p5, %s2491_s27, %s34_s8  }
  0x19   : > { %p2618_p9 = por %p42_p7, %p41_p6  ;;  %p3295_p10 = scmp.eq.s32.totalorder %s2603_s29, 0 }
  0x1a   : > { %p155_p11 = scmp.eq.s32.totalorder %s2603_s29, 1  ;;  %p1807_p12 = scmp.ge.s32.totalorder %s2495_s28, 1 }
  0x1b   : > { %s3299_s10 = scalar_select %p2618_p9, 1, 0 }
  0x1c   : > { %p2627_p13 = por %p3295_p10, %p47_p8  ;;  %p168_p0 = scmp.lt.s32.totalorder %s2495_s28, 3 }
  0x1d   : > { %p2632_p1 = por %p155_p11, %p41_p6  ;;  %s2534_s14 = smov [#allocation7]  }
  0x1e   : > { %s3300_s11 = scalar_select %p2627_p13, 1, 0 }
  0x1f   : > { %s3301_s12 = scalar_select %p2632_p1, 1, 0 }
  0x20   : > { %p2636_p2 = pnand %p1807_p12, %p168_p0  ;;  %s180_s15 = sshll.u32 %s2534_s14, 4  ;;  %s181_s15 = int_to_ptr.vmem [resolvable:$true] %s180_s15 }
  0x21   : > { %s2535_s17 = smov [#allocation10]   ;;  %s3304_s2 = sld [smem:[#allocation18_spill]] }
  0x22   : > { %s3302_s13 = scalar_select %p2636_p2, 1, 0 }
  0x23   : > { %p2096_p3 = pneg %p2636_p2  ;;  %s204_s18 = sshll.u32 %s2535_s17, 4  ;;  %s2648_s18 = int_to_ptr.vmem [resolvable:$true] %s204_s18 }
  0x25   : > { %p2644_p4 = pnand %p2096_p3, %p3295_p10 }
  0x27   : > { %s2275_s21 = scalar_lea.hbm %s3304_s2, 8192  ;;  %p2658_p6 = pneg %p2644_p4 }
  0x28   : > { %p2276_p5 = scmp.ne.s32.totalorder %s3304_s2, %s2275_s21  ;;  %p2282_p11 = scmp.lt.u32.totalorder %s2275_s21, %s3304_s2 }
  0x2a   : > { %p2278_p7 = pnand %p2658_p6, %p2276_p5 }
  0x2c   : > { %p2279_p8 = pneg %p2278_p7 }
  0x2e   : > { %p2284_p12 = pnand %p2282_p11, %p2279_p8 }
  0x30   : > { %2287 = shalt.err (!%p2284_p12)
}
  0x31   : > { %s2288_s7 = scalar_lea.vmem %s181_s15, 8192  ;;  %p2296_p1 = scmp.lt.s32.totalorder %s181_s15, %s181_s15 }
  0x32   : > { %p2289_p0 = scmp.ne.s32.totalorder %s181_s15, %s2288_s7  ;;  %p2297_p13 = scmp.lt.s32.totalorder %s2288_s7, %s2288_s7 }
  0x34   : > { %p2291_p3 = pnand %p2289_p0, %p2658_p6  ;;  %p2298_p2 = por %p2297_p13, %p2296_p1 }
  0x36   : > { %p2292_p10 = pneg %p2291_p3 }
  0x38   : > { %p2299_p9 = pnand %p2298_p2, %p2292_p10 }
  0x3a   : > { %2302 = shalt.err (!%p2299_p9)
}
  0x3b   : > { %s2536_s8 = smov 256   ;;  %s2537_s14 = smov 16  }
  0x3c   : > { %2099 = dma.hbm_to_vmem [thread:$0]  (!%p2644_p4), %s3304_s2, 8192, %s181_s15, [#allocation8], %s2536_s8, %s2536_s8, %s2537_s14  }
  0x3d   : > { %s2303_s22 = scalar_lea.hbm %s3292_s4, 4096 }
  0x3e   : > { %p2304_p5 = scmp.ne.s32.totalorder %s3292_s4, %s2303_s22  ;;  %p2310_p13 = scmp.lt.u32.totalorder %s2303_s22, %s3292_s4 }
  0x40   : > { %p2306_p10 = pnand %p2304_p5, %p2658_p6 }
  0x42   : > { %p2307_p9 = pneg %p2306_p10 }
  0x44   : > { %p2312_p1 = pnand %p2310_p13, %p2307_p9 }
  0x46   : > { %2315 = shalt.err (!%p2312_p1)
}
  0x47   : > { %s2316_s15 = scalar_lea.vmem %s2648_s18, 4096  ;;  %p2324_p11 = scmp.lt.s32.totalorder %s2648_s18, %s2648_s18 }
  0x48   : > { %p2317_p2 = scmp.ne.s32.totalorder %s2648_s18, %s2316_s15  ;;  %p2325_p12 = scmp.lt.s32.totalorder %s2316_s15, %s2316_s15 }
  0x4a   : > { %p2319_p7 = pnand %p2317_p2, %p2658_p6  ;;  %p2326_p0 = por %p2325_p12, %p2324_p11 }
  0x4c   : > { %p2320_p8 = pneg %p2319_p7 }
  0x4e   : > { %p2327_p3 = pnand %p2326_p0, %p2320_p8 }
  0x50   : > { %2330 = shalt.err (!%p2327_p3)
}
  0x51   : > { %s2538_s8 = smov 128   ;;  %s2539_s14 = smov 8  }
  0x52   : > { %2105 = dma.hbm_to_vmem [thread:$0]  (!%p2644_p4), %s3292_s4, 4096, %s2648_s18, [#allocation11], %s2538_s8, %s2538_s8, %s2539_s14  }
  0x53   : > { %s2540_s20 = smov [#allocation9]   ;;  %s2541_s22 = smov [#allocation12]  }
  0x54   : > { %s194_s21 = sshll.u32 %s2540_s20, 4  ;;  %s218_s23 = sshll.u32 %s2541_s22, 4  ;;  %s195_s21 = int_to_ptr.vmem [resolvable:$true] %s194_s21  ;;  %s2697_s23 = int_to_ptr.vmem [resolvable:$true] %s218_s23 }
  0x55   : > { %s2331_s7 = scalar_lea.hbm %s3291_s3, 32 }
  0x56   : > { %p2332_p5 = scmp.ne.s32.totalorder %s3291_s3, %s2331_s7  ;;  %p2338_p13 = scmp.lt.u32.totalorder %s2331_s7, %s3291_s3 }
  0x58   : > { %p2334_p10 = pnand %p2332_p5, %p2658_p6 }
  0x5a   : > { %p2335_p9 = pneg %p2334_p10 }
  0x5c   : > { %p2340_p1 = pnand %p2338_p13, %p2335_p9 }
  0x5e   : > { %2343 = shalt.err (!%p2340_p1)
}
  0x5f   : > { %s2344_s8 = scalar_lea.vmem %s195_s21, 32  ;;  %p2352_p11 = scmp.lt.s32.totalorder %s195_s21, %s195_s21 }
  0x60   : > { %p2345_p2 = scmp.ne.s32.totalorder %s195_s21, %s2344_s8  ;;  %p2353_p12 = scmp.lt.s32.totalorder %s2344_s8, %s2344_s8 }
  0x62   : > { %p2347_p7 = pnand %p2345_p2, %p2658_p6  ;;  %p2354_p0 = por %p2353_p12, %p2352_p11 }
  0x64   : > { %p2348_p8 = pneg %p2347_p7 }
  0x66   : > { %p2355_p3 = pnand %p2354_p0, %p2348_p8 }
  0x68   : > { %2358 = shalt.err (!%p2355_p3)
}
  0x69   : > { %2102 = dma.hbm_to_vmem [thread:$0]  (!%p2644_p4), %s3291_s3, 32, %s195_s21, [#allocation8]  }
  0x6a   : > { %s2359_s22 = scalar_lea.hbm %s3293_s5, 16 }
  0x6b   : > { %p2360_p5 = scmp.ne.s32.totalorder %s3293_s5, %s2359_s22  ;;  %p2366_p13 = scmp.lt.u32.totalorder %s2359_s22, %s3293_s5 }
  0x6d   : > { %p2362_p10 = pnand %p2360_p5, %p2658_p6 }
  0x6f   : > { %p2363_p9 = pneg %p2362_p10 }
  0x71   : > { %p2368_p1 = pnand %p2366_p13, %p2363_p9 }
  0x73   : > { %2371 = shalt.err (!%p2368_p1)
}
  0x74   : > { %s2372_s21 = scalar_lea.vmem %s2697_s23, 16  ;;  %s2379_s17 = scalar_lea.vmem %s2697_s23, 32 }
  0x75   : > { %p2373_p2 = scmp.ne.s32.totalorder %s2697_s23, %s2372_s21  ;;  %p2380_p11 = scmp.lt.s32.totalorder %s2697_s23, %s2697_s23 }
  0x76   : > { %p2381_p12 = scmp.lt.s32.totalorder %s2379_s17, %s2372_s21 }
  0x77   : > { %p2375_p7 = pnand %p2373_p2, %p2658_p6 }
  0x78   : > { %p2382_p0 = por %p2381_p12, %p2380_p11 }
  0x79   : > { %p2376_p8 = pneg %p2375_p7 }
  0x7b   : > { %p2383_p3 = pnand %p2382_p0, %p2376_p8 }
  0x7d   : > { %2386 = shalt.err (!%p2383_p3)
}
  0x7e   : > { %2108 = dma.hbm_to_vmem [thread:$0]  (!%p2644_p4), %s3293_s5, 16, %s2697_s23, [#allocation11]  }
  0x7f   : > { %p1812_p5 = scmp.ge.s32.totalorder %s2495_s28, 2 }
  0x80   : > { %p3306_p6 = scmp.ne.s32.totalorder (!%p1812_p5), %s3299_s10, 0 }
  0x81   : > { %225 = sbr.rel (%p1812_p5) target bundleno = 171 (0xab), region = 32 }
  0x88   : > { %228 = sbr.rel (!%p3306_p6) target bundleno = 171 (0xab), region = 36  ;;  %s229_s24 = sand.u32 (%p3306_p6), 1, %s2491_s27  }
  0x89   : > { %s234_s2 = smul.u32 (%p3306_p6), 12, %s2495_s28  ;;  %s2749_s22 = scalar_lea.sflag (%p3306_p6), [#allocation6], %s229_s24 }
  0x8a   : > { %s2076_s14 = smul.u32 (%p3306_p6), 192, %s229_s24 }
  0x8b   : > { %s235_s19 = ssub.s32 (%p3306_p6), 20, %s234_s2 }
  0x8c   : > { %p236_p10 = scmp.lt.s32.totalorder (%p3306_p6), %s235_s19, 12  ;;  %s233_s23 = scalar_lea.vmem (%p3306_p6), [#allocation5], %s2076_s14 }
  0x8f   : > { %s3324_s19 = smov (!%p236_p10, %s235_s19), 12 }
  0x90   : > { %s2746_s16 = sshll.u32 %s3324_s19, 8 }
  0x91   : > { %s241_s20 = ssub.s32 3072, %s2746_s16 }
  0x92   : > { %242 = vsyncadd %s2749_s22, %s241_s20  ;;  %p1815_p4 = scmp.ne.s32.totalorder %s2746_s16, 0  ;;  %s1898_s10 = smul.u32 3072, %s2495_s28 }
  0x93   : > { %s248_s25 = sshll.u32 %s233_s23, 4  ;;  %s2391_s28 = scalar_lea.hbm %s3289_s1, 5120  ;;  %s2759_s25 = int_to_ptr.vmem [resolvable:$true] %s248_s25 }
  0x94   : > { %s2757_s15 = scalar_lea.hbm %s3289_s1, %s1898_s10 }
  0x95   : > { %s2387_s21 = scalar_lea.hbm %s2757_s15, %s2746_s16  ;;  %p2392_p2 = scmp.lt.u32.totalorder %s2757_s15, %s3289_s1 }
  0x96   : > { %p2388_p9 = scmp.ne.s32.totalorder %s2757_s15, %s2387_s21  ;;  %p2393_p7 = scmp.lt.u32.totalorder %s2391_s28, %s2387_s21 }
  0x97   : > { %p2395_p11 = scmp.lt.u32.totalorder %s2387_s21, %s2757_s15 }
  0x98   : > { %p2389_p13 = pnand %p2388_p9, %p1815_p4  ;;  %p2394_p8 = por %p2393_p7, %p2392_p2 }
  0x9a   : > { %p2390_p1 = pneg %p2389_p13  ;;  %p2396_p12 = por %p2395_p11, %p2394_p8 }
  0x9c   : > { %p2397_p0 = pnand %p2396_p12, %p2390_p1 }
  0x9e   : > { %2400 = shalt.err (!%p2397_p0)
}
  0x9f   : > { %s2401_s2 = scalar_lea.vmem %s2759_s25, %s2746_s16  ;;  %s2542_s14 = smov [#allocation5]  }
  0xa0   : > { %p2402_p3 = scmp.ne.s32.totalorder %s2759_s25, %s2401_s2  ;;  %s2405_s19 = sshll.u32 %s2542_s14, 4  ;;  %s2406_s19 = int_to_ptr.vmem [resolvable:$false] %s2405_s19 }
  0xa1   : > { %s2407_s20 = scalar_lea.vmem %s2406_s19, 6144  ;;  %p2408_p10 = scmp.lt.s32.totalorder %s2759_s25, %s2406_s19 }
  0xa2   : > { %p2403_p5 = pnand %p2402_p3, %p1815_p4  ;;  %p2409_p9 = scmp.lt.s32.totalorder %s2407_s20, %s2401_s2 }
  0xa4   : > { %p2404_p6 = pneg %p2403_p5  ;;  %p2410_p13 = por %p2409_p9, %p2408_p10 }
  0xa6   : > { %p2411_p2 = pnand %p2410_p13, %p2404_p6 }
  0xa8   : > { %2414 = shalt.err (!%p2411_p2)
}
  0xa9   : > { %s2543_s23 = smov 256   ;;  %s2544_s10 = smov 16  }
  0xaa   : > { %254 = dma.hbm_to_vmem [thread:$0]  (%p1815_p4), %s2757_s15, %s2746_s16, %s2759_s25, %s2749_s22, %s2543_s23, %s2543_s23, %s2544_s10  }
  0xab PF: > { %p3307_p1 = scmp.ne.s32.totalorder %s3302_s13, 0 }
  0xac   : > { %s2789_s26 = sand.u32 (!%p3307_p1), 1, %s2487_s0   ;;  %p3308_p7 = scmp.ne.s32.totalorder (!%p3307_p1), %s3300_s11, 0 }
  0xad   : > { %260 = sbr.rel (%p3307_p1) target bundleno = 1682 (0x692), region = 40  ;;  %s263_s21 = scalar_lea.sflag (!%p3307_p1), [#allocation6], %s2789_s26 }
  0xae   : > { %s2077_s7 = smul.u32 (!%p3307_p1), 192, %s2789_s26 }
  0xb0   : > { %s2793_s17 = scalar_lea.vmem (!%p3307_p1), [#allocation5], %s2077_s7 }
  0xb4   : > { %2470 = dma.done.wait (%p3308_p7), %s263_s21, 3072  }
  0xb5   : > { %2472 = vsyncadd (%p3308_p7), %s263_s21, 4294964224  ;;  %p3309_p4 = scmp.eq.s32.totalorder %s2603_s29, 0 }
  0xb7   : > { %2474 = dma.done.wait (%p3309_p4), [#allocation8], 8224   ;;  %p3310_p8 = pmov %p3309_p4 }
  0xb8   : > { %p3311_p11 = pmov %p3309_p4 }
  0xb9   : > { %2476 = vsyncadd (%p3310_p8), [#allocation8], 4294959072 }
  0xba   : > { %2478 = dma.done.wait (%p3311_p11), [#allocation11], 4112   ;;  %p3312_p12 = pmov %p3309_p4 }
  0xbb   : > { %s2078_s13 = smul.u32 1536, %s2789_s26  ;;  %v346_v0 = vld [vmem:[#allocation7 + $0x8] sm:$0xff]  ;;  %v348_v1 = vld [vmem:[#allocation7 + $0x18] sm:$0xff]  ;;  %v345_v2 = vld [vmem:[#allocation7] sm:$0xff]  ;;  %s2877_s16 = smov 0  }
  0xbc   : > { %2480 = vsyncadd (%p3312_p12), [#allocation11], 4294963184  ;;  %v1968_v3 = vpack.c.bf16 %v348_v1, %v346_v0  ;;  %v347_v4 = vld [vmem:[#allocation7 + $0x10] sm:$0xff]  ;;  %v350_v5 = vld [vmem:[#allocation7 + $0x28] sm:$0xff] }
  0xbd   : > { %v352_v6 = vld [vmem:[#allocation7 + $0x38] sm:$0xff]  ;;  %v1970_v7 = vpack.c.bf16 %v347_v4, %v345_v2  ;;  %v349_v9 = vld [vmem:[#allocation7 + $0x20] sm:$0xff]  ;;  %v351_v10 = vld [vmem:[#allocation7 + $0x30] sm:$0xff]  ;;  %s2875_s11 = scalar_lea.vmem [#allocation13], %s2078_s13  }
  0xbe   : > { %v1972_v8 = vpack.c.bf16 %v352_v6, %v350_v5  ;;  %v354_v11 = vld [vmem:[#allocation7 + $0x48] sm:$0xff]  ;;  %1969 = vmatprep.subr.bf16.mxu0 %v1968_v3  ;;  %v356_v12 = vld [vmem:[#allocation7 + $0x58] sm:$0xff]  ;;  %v1974_v13 = vpack.c.bf16 %v351_v10, %v349_v9  ;;  %v353_v15 = vld [vmem:[#allocation7 + $0x40] sm:$0xff] }
  0xbf   : > { %1971 = vmatpush1.bf16.msra.mxu0 %v1970_v7  ;;  %v1976_v14 = vpack.c.bf16 %v356_v12, %v354_v11  ;;  %v355_v16 = vld [vmem:[#allocation7 + $0x50] sm:$0xff]  ;;  %v358_v17 = vld [vmem:[#allocation7 + $0x68] sm:$0xff]  ;;  %v360_v18 = vld [vmem:[#allocation7 + $0x78] sm:$0xff] }
  0xc0   : > { %1973 = vmatprep.subr.bf16.mxu0 %v1972_v8  ;;  %v1978_v19 = vpack.c.bf16 %v355_v16, %v353_v15  ;;  %v1980_v20 = vpack.c.bf16 %v360_v18, %v358_v17  ;;  %v357_v21 = vld [vmem:[#allocation7 + $0x60] sm:$0xff]  ;;  %v359_v22 = vld [vmem:[#allocation7 + $0x70] sm:$0xff]  ;;  %v362_v23 = vld [vmem:[#allocation7 + $0x88] sm:$0xff] }
  0xc1   : > { %v364_v24 = vld [vmem:[#allocation7 + $0x98] sm:$0xff]  ;;  %v1982_v25 = vpack.c.bf16 %v359_v22, %v357_v21  ;;  %v361_v27 = vld [vmem:[#allocation7 + $0x80] sm:$0xff]  ;;  %v363_v28 = vld [vmem:[#allocation7 + $0x90] sm:$0xff] }
  0xc2   : > { %v1984_v26 = vpack.c.bf16 %v364_v24, %v362_v23  ;;  %v366_v29 = vld [vmem:[#allocation7 + $0xa8] sm:$0xff]  ;;  %v368_v30 = vld [vmem:[#allocation7 + $0xb8] sm:$0xff]  ;;  %v1986_v31 = vpack.c.bf16 %v363_v28, %v361_v27  ;;  %v365_v33 = vld [vmem:[#allocation7 + $0xa0] sm:$0xff] }
  0xc3   : > { %1975 = vmatpush1.bf16.msra.mxu0 %v1974_v13  ;;  %v1988_v32 = vpack.c.bf16 %v368_v30, %v366_v29  ;;  %v367_v34 = vld [vmem:[#allocation7 + $0xb0] sm:$0xff]  ;;  %v370_v35 = vld [vmem:[#allocation7 + $0xc8] sm:$0xff]  ;;  %v372_v36 = vld [vmem:[#allocation7 + $0xd8] sm:$0xff] }
  0xc4   : > { %1977 = vmatprep.subr.bf16.mxu0 %v1976_v14  ;;  %v1990_v37 = vpack.c.bf16 %v367_v34, %v365_v33  ;;  %v1992_v38 = vpack.c.bf16 %v372_v36, %v370_v35  ;;  %v369_v39 = vld [vmem:[#allocation7 + $0xc0] sm:$0xff]  ;;  %v371_v40 = vld [vmem:[#allocation7 + $0xd0] sm:$0xff]  ;;  %v322_v41 = vld [vmem:[%s2793_s17 + $0x8] sm:$0xff] }
  0xc5   : > { %v374_v42 = vld [vmem:[#allocation7 + $0xe8] sm:$0xff]  ;;  %v376_v43 = vld [vmem:[#allocation7 + $0xf8] sm:$0xff]  ;;  %485 = vmatprep.mubr.f32.mxu0 %v322_v41  ;;  %v1994_v44 = vpack.c.bf16 %v371_v40, %v369_v39  ;;  %v373_v46 = vld [vmem:[#allocation7 + $0xe0] sm:$0xff] }
  0xc6   : > { %v1996_v45 = vpack.c.bf16 %v376_v43, %v374_v42  ;;  %v375_v47 = vld [vmem:[#allocation7 + $0xf0] sm:$0xff]  ;;  %v378_v48 = vld [vmem:[#allocation7 + $0x108] sm:$0xff]  ;;  %v380_v49 = vld [vmem:[#allocation7 + $0x118] sm:$0xff] }
  0xc7   : > { %1979 = vmatpush1.bf16.msra.mxu0 %v1978_v19  ;;  %v1998_v50 = vpack.c.bf16 %v375_v47, %v373_v46  ;;  %v377_v51 = vld [vmem:[#allocation7 + $0x100] sm:$0xff]  ;;  %v379_v52 = vld [vmem:[#allocation7 + $0x110] sm:$0xff]  ;;  %v382_v53 = vld [vmem:[#allocation7 + $0x128] sm:$0xff]  ;;  %v2000_v54 = vpack.c.bf16 %v380_v49, %v378_v48 }
  0xc8   : > { %1981 = vmatprep.subr.bf16.mxu0 %v1980_v20  ;;  %v384_v55 = vld [vmem:[#allocation7 + $0x138] sm:$0xff]  ;;  %v598_v56 = vld [vmem:[#allocation10 + $0x80] sm:$0xff]  ;;  %v599_v57 = vld [vmem:[#allocation10 + $0x88] sm:$0xff]  ;;  %v2002_v2 = vpack.c.bf16 %v379_v52, %v377_v51 }
  0xc9   : > { %v2032_v58 = vpack.c.bf16 %v599_v57, %v598_v56  ;;  %v582_v59 = vld [vmem:[#allocation10] sm:$0xff]  ;;  %v583_v60 = vld [vmem:[#allocation10 + $0x8] sm:$0xff]  ;;  %v600_v61 = vld [vmem:[#allocation10 + $0x90] sm:$0xff]  ;;  %v2004_v6 = vpack.c.bf16 %v384_v55, %v382_v53 }
  0xca   : > { %v2034_v62 = vpack.c.bf16 %v583_v60, %v582_v59  ;;  %v601_v63 = vld [vmem:[#allocation10 + $0x98] sm:$0xff]  ;;  %v584_v0 = vld [vmem:[#allocation10 + $0x10] sm:$0xff]  ;;  %v602_v4 = vld [vmem:[#allocation10 + $0xa0] sm:$0xff] }
  0xcb   : > { %1983 = vmatpush1.bf16.msra.mxu0 %v1982_v25  ;;  %v585_v1 = vld [vmem:[#allocation10 + $0x18] sm:$0xff]  ;;  %2033 = vmatprep.subr.bf16.mxu1 %v2032_v58  ;;  %v2036_v3 = vpack.c.bf16 %v601_v63, %v600_v61  ;;  %v603_v5 = vld [vmem:[#allocation10 + $0xa8] sm:$0xff]  ;;  %v586_v13 = vld [vmem:[#allocation10 + $0x20] sm:$0xff] }
  0xcc   : > { %1985 = vmatprep.subr.bf16.mxu0 %v1984_v26  ;;  %v381_v7 = vld [vmem:[#allocation7 + $0x120] sm:$0xff]  ;;  %v383_v8 = vld [vmem:[#allocation7 + $0x130] sm:$0xff]  ;;  %v386_v9 = vld [vmem:[#allocation7 + $0x148] sm:$0xff]  ;;  %2035 = vmatpush3.bf16.msra.mxu1 %v2034_v62  ;;  %v2038_v10 = vpack.c.bf16 %v585_v1, %v584_v0  ;;  %v2040_v12 = vpack.c.bf16 %v603_v5, %v602_v4 }
  0xcd   : > { %v388_v11 = vld [vmem:[#allocation7 + $0x158] sm:$0xff]  ;;  %2037 = vmatprep.subr.bf16.mxu1 %v2036_v3  ;;  %v587_v14 = vld [vmem:[#allocation10 + $0x28] sm:$0xff]  ;;  %v2006_v17 = vpack.c.bf16 %v383_v8, %v381_v7  ;;  %v385_v19 = vld [vmem:[#allocation7 + $0x140] sm:$0xff] }
  0xce   : > { %v604_v15 = vld [vmem:[#allocation10 + $0xb0] sm:$0xff]  ;;  %v605_v16 = vld [vmem:[#allocation10 + $0xb8] sm:$0xff]  ;;  %v2008_v18 = vpack.c.bf16 %v388_v11, %v386_v9  ;;  %v390_v21 = vld [vmem:[#allocation7 + $0x168] sm:$0xff]  ;;  %v2042_v22 = vpack.c.bf16 %v587_v14, %v586_v13 }
  0xcf   : > { %1987 = vmatpush1.bf16.msra.mxu0 %v1986_v31  ;;  %v387_v20 = vld [vmem:[#allocation7 + $0x150] sm:$0xff]  ;;  %v392_v23 = vld [vmem:[#allocation7 + $0x178] sm:$0xff]  ;;  %v2044_v24 = vpack.c.bf16 %v605_v16, %v604_v15  ;;  %v606_v27 = vld [vmem:[#allocation10 + $0xc0] sm:$0xff] }
  0xd0   : > { %1989 = vmatprep.subr.bf16.mxu0 %v1988_v32  ;;  %2039 = vmatpush3.bf16.msra.mxu1 %v2038_v10  ;;  %v588_v25 = vld [vmem:[#allocation10 + $0x30] sm:$0xff]  ;;  %v589_v26 = vld [vmem:[#allocation10 + $0x38] sm:$0xff]  ;;  %v607_v28 = vld [vmem:[#allocation10 + $0xc8] sm:$0xff]  ;;  %v2010_v29 = vpack.c.bf16 %v387_v20, %v385_v19  ;;  %v2012_v30 = vpack.c.bf16 %v392_v23, %v390_v21 }
  0xd1   : > { %2041 = vmatprep.subr.bf16.mxu1 %v2040_v12  ;;  %v389_v31 = vld [vmem:[#allocation7 + $0x160] sm:$0xff]  ;;  %v391_v32 = vld [vmem:[#allocation7 + $0x170] sm:$0xff]  ;;  %v394_v33 = vld [vmem:[#allocation7 + $0x188] sm:$0xff]  ;;  %v2046_v34 = vpack.c.bf16 %v589_v26, %v588_v25  ;;  %v2048_v36 = vpack.c.bf16 %v607_v28, %v606_v27 }
  0xd2   : > { %v396_v35 = vld [vmem:[#allocation7 + $0x198] sm:$0xff]  ;;  %v2014_v41 = vpack.c.bf16 %v391_v32, %v389_v31  ;;  %v393_v43 = vld [vmem:[#allocation7 + $0x180] sm:$0xff]  ;;  %v611_v52 = vld [vmem:[#allocation10 + $0xe8] sm:$0xff]  ;;  %v411_v31 = vlaneseq }
  0xd3   : > { %1991 = vmatpush1.bf16.msra.mxu0 %v1990_v37  ;;  %v590_v37 = vld [vmem:[#allocation10 + $0x40] sm:$0xff]  ;;  %v608_v39 = vld [vmem:[#allocation10 + $0xd0] sm:$0xff]  ;;  %v609_v40 = vld [vmem:[#allocation10 + $0xd8] sm:$0xff]  ;;  %v2016_v42 = vpack.c.bf16 %v396_v35, %v394_v33 }
  0xd4   : > { %1993 = vmatprep.subr.bf16.mxu0 %v1992_v38  ;;  %2043 = vmatpush3.bf16.msra.mxu1 %v2042_v22  ;;  %v591_v38 = vld [vmem:[#allocation10 + $0x48] sm:$0xff]  ;;  %v400_v47 = vld [vmem:[#allocation7 + $0x1b8] sm:$0xff]  ;;  %v2052_v48 = vpack.c.bf16 %v609_v40, %v608_v39  ;;  %v610_v51 = vld [vmem:[#allocation10 + $0xe0] sm:$0xff] }
  0xd5   : > { %2045 = vmatprep.subr.bf16.mxu1 %v2044_v24  ;;  %v2050_v46 = vpack.c.bf16 %v591_v38, %v590_v37  ;;  %v592_v49 = vld [vmem:[#allocation10 + $0x50] sm:$0xff]  ;;  %v397_v55 = vld [vmem:[#allocation7 + $0x1a0] sm:$0xff]  ;;  %v402_v58 = vld [vmem:[#allocation7 + $0x1c8] sm:$0xff]  ;;  %v2056_v60 = vpack.c.bf16 %v611_v52, %v610_v51  ;;  %v2832_v37 = vshrl.u32 %v411_v31, 7 }
  0xd6   : > { %v399_v56 = vld [vmem:[#allocation7 + $0x1b0] sm:$0xff]  ;;  %v404_v59 = vld [vmem:[#allocation7 + $0x1d8] sm:$0xff]  ;;  %v401_v63 = vld [vmem:[#allocation7 + $0x1c0] sm:$0xff] }
  0xd7   : > { %1995 = vmatpush1.bf16.msra.mxu0 %v1994_v44  ;;  %v395_v44 = vld [vmem:[#allocation7 + $0x190] sm:$0xff]  ;;  %v2022_v61 = vpack.c.bf16 %v399_v56, %v397_v55  ;;  %v2024_v62 = vpack.c.bf16 %v404_v59, %v402_v58  ;;  %v406_v1 = vld [vmem:[#allocation7 + $0x1e8] sm:$0xff]  ;;  %v405_v5 = vld [vmem:[#allocation7 + $0x1e0] sm:$0xff] }
  0xd8   : > { %1997 = vmatprep.subr.bf16.mxu0 %v1996_v45  ;;  %v398_v45 = vld [vmem:[#allocation7 + $0x1a8] sm:$0xff]  ;;  %2047 = vmatpush3.bf16.msra.mxu1 %v2046_v34  ;;  %v2018_v53 = vpack.c.bf16 %v395_v44, %v393_v43  ;;  %v403_v0 = vld [vmem:[#allocation7 + $0x1d0] sm:$0xff]  ;;  %v321_v8 = vld [vmem:[%s2793_s17] sm:$0xff]  ;;  %v2838_v43 = vadd.s32 16, %v2832_v37  ;;  %v2841_v44 = vadd.s32 24, %v2832_v37 }
  0xd9   : > { %2049 = vmatprep.subr.bf16.mxu1 %v2048_v36  ;;  %v2026_v3 = vpack.c.bf16 %v403_v0, %v401_v63  ;;  %v324_v9 = vld [vmem:[%s2793_s17 + $0x18] sm:$0xff]  ;;  %v323_v10 = vld [vmem:[%s2793_s17 + $0x10] sm:$0xff]  ;;  %v326_v11 = vld [vmem:[%s2793_s17 + $0x28] sm:$0xff] }
  0xda   : > { %v325_v12 = vld [vmem:[%s2793_s17 + $0x20] sm:$0xff]  ;;  %v328_v13 = vld [vmem:[%s2793_s17 + $0x38] sm:$0xff]  ;;  %v327_v14 = vld [vmem:[%s2793_s17 + $0x30] sm:$0xff] }
  0xdb   : > { %1999 = vmatpush1.bf16.msra.mxu0 %v1998_v50  ;;  %v593_v50 = vld [vmem:[#allocation10 + $0x58] sm:$0xff]  ;;  %v330_v15 = vld [vmem:[%s2793_s17 + $0x48] sm:$0xff]  ;;  %v335_v22 = vld [vmem:[%s2793_s17 + $0x70] sm:$0xff] }
  0xdc   : > { %2001 = vmatprep.subr.bf16.mxu0 %v2000_v54  ;;  %v2020_v54 = vpack.c.bf16 %v400_v47, %v398_v45  ;;  %2051 = vmatpush3.bf16.msra.mxu1 %v2050_v46  ;;  %v2054_v57 = vpack.c.bf16 %v593_v50, %v592_v49  ;;  %v329_v16 = vld [vmem:[%s2793_s17 + $0x40] sm:$0xff]  ;;  %v334_v19 = vld [vmem:[%s2793_s17 + $0x68] sm:$0xff]  ;;  %v336_v21 = vld [vmem:[%s2793_s17 + $0x78] sm:$0xff]  ;;  %v413_v45 = vsub.s32 0, %v2832_v37  ;;  %v417_v47 = vsub.s32 1, %v2832_v37 }
  0xdd   : > { %2053 = vmatprep.subr.bf16.mxu1 %v2052_v48  ;;  %v333_v20 = vld [vmem:[%s2793_s17 + $0x60] sm:$0xff]  ;;  %v338_v23 = vld [vmem:[%s2793_s17 + $0x88] sm:$0xff]  ;;  %v340_v25 = vld [vmem:[%s2793_s17 + $0x98] sm:$0xff] }
  0xde   : > { %v337_v24 = vld [vmem:[%s2793_s17 + $0x80] sm:$0xff]  ;;  %v339_v26 = vld [vmem:[%s2793_s17 + $0x90] sm:$0xff]  ;;  %v342_v27 = vld [vmem:[%s2793_s17 + $0xa8] sm:$0xff] }
  0xdf   : > { %2003 = vmatpush1.bf16.msra.mxu0 %v2002_v2  ;;  %v408_v2 = vld [vmem:[#allocation7 + $0x1f8] sm:$0xff]  ;;  %v341_v28 = vld [vmem:[%s2793_s17 + $0xa0] sm:$0xff]  ;;  %v595_v33 = vld [vmem:[#allocation10 + $0x68] sm:$0xff] }
  0xe0   : > { %2005 = vmatprep.subr.bf16.mxu0 %v2004_v6  ;;  %2055 = vmatpush3.bf16.msra.mxu1 %v2054_v57  ;;  %v2028_v4 = vpack.c.bf16 %v408_v2, %v406_v1  ;;  %v407_v6 = vld [vmem:[#allocation7 + $0x1f0] sm:$0xff]  ;;  %v594_v32 = vld [vmem:[#allocation10 + $0x60] sm:$0xff]  ;;  %v613_v36 = vld [vmem:[#allocation10 + $0xf8] sm:$0xff] }
  0xe1   : > { %2057 = vmatprep.subr.bf16.mxu1 %v2056_v60  ;;  %v2030_v7 = vpack.c.bf16 %v407_v6, %v405_v5  ;;  %v2058_v34 = vpack.c.bf16 %v595_v33, %v594_v32  ;;  %v612_v35 = vld [vmem:[#allocation10 + $0xf0] sm:$0xff]  ;;  %v597_v40 = vld [vmem:[#allocation10 + $0x78] sm:$0xff] }
  0xe2   : > { %v2060_v38 = vpack.c.bf16 %v613_v36, %v612_v35  ;;  %v596_v39 = vld [vmem:[#allocation10 + $0x70] sm:$0xff]  ;;  %v409_v46 = vld [vmem:[#allocation9] sm:$0x3] }
  0xe3   : > { %2007 = vmatpush1.bf16.msra.mxu0 %v2006_v17  ;;  %v332_v17 = vld [vmem:[%s2793_s17 + $0x58] sm:$0xff]  ;;  %v2845_v48 = vrot.slane %v409_v46, %v413_v45  ;;  %v2847_v49 = vrot.slane %v409_v46, %v417_v47 }
  0xe4   : > { %2009 = vmatprep.subr.bf16.mxu0 %v2008_v18  ;;  %v331_v18 = vld [vmem:[%s2793_s17 + $0x50] sm:$0xff]  ;;  %2059 = vmatpush3.bf16.msra.mxu1 %v2058_v34 }
  0xe5   : > { %2061 = vmatprep.subr.bf16.mxu1 %v2060_v38 }
  0xe7   : > { %2011 = vmatpush1.bf16.msra.mxu0 %v2010_v29  ;;  %v344_v29 = vld [vmem:[%s2793_s17 + $0xb8] sm:$0xff] }
  0xe8   : > { %2013 = vmatprep.subr.bf16.mxu0 %v2012_v30  ;;  %v343_v30 = vld [vmem:[%s2793_s17 + $0xb0] sm:$0xff] }
  0xeb   : > { %2015 = vmatpush1.bf16.msra.mxu0 %v2014_v41  ;;  %v2062_v41 = vpack.c.bf16 %v597_v40, %v596_v39 }
  0xec   : > { %2017 = vmatprep.subr.bf16.mxu0 %v2016_v42  ;;  %v2835_v42 = vadd.s32 8, %v2832_v37 }
  0xed   : > { %2063 = vmatpush3.bf16.msra.mxu1 %v2062_v41 }
  0xef   : > { %2019 = vmatpush1.bf16.msra.mxu0 %v2018_v53 }
  0xf0   : > { %2021 = vmatprep.subr.bf16.mxu0 %v2020_v54 }
  0xf3   : > { %2023 = vmatpush1.bf16.msra.mxu0 %v2022_v61 }
  0xf4   : > { %2025 = vmatprep.subr.bf16.mxu0 %v2024_v62 }
  0xf7   : > { %2027 = vmatpush1.bf16.msra.mxu0 %v2026_v3 }
  0xf8   : > { %2029 = vmatprep.subr.bf16.mxu0 %v2028_v4 }
  0xfb   : > { %2031 = vmatpush1.bf16.msra.mxu0 %v2030_v7 }
  0xfe   : > { %486 = vmatmul.mubr.f32.vlgmr.msra.gmra.mrb[0].mxu0 %v321_v8 }
  0xff   : > { %491 = vmatprep.mubr.f32.mxu0 %v324_v9 }
 0x102   : > { %492 = vmatmul.mubr.f32.gmra.mrb[2].mxu0 %v323_v10 }
 0x103   : > { %497 = vmatprep.mubr.f32.mxu0 %v326_v11 }
 0x106   : > { %498 = vmatmul.mubr.f32.gmra.mrb[4].mxu0 %v325_v12 }
 0x107   : > { %503 = vmatprep.mubr.f32.mxu0 %v328_v13 }
 0x10a   : > { %504 = vmatmul.mubr.f32.gmra.mrb[6].mxu0 %v327_v14 }
 0x10b   : > { %509 = vmatprep.mubr.f32.mxu0 %v330_v15 }
 0x10e   : > { %510 = vmatmul.mubr.f32.gmra.mrb[8].mxu0 %v329_v16 }
 0x10f   : > { %515 = vmatprep.mubr.f32.mxu0 %v332_v17 }
 0x112   : > { %516 = vmatmul.mubr.f32.gmra.mrb[10].mxu0 %v331_v18 }
 0x113   : > { %521 = vmatprep.mubr.f32.mxu0 %v334_v19 }
 0x116   : > { %522 = vmatmul.mubr.f32.gmra.mrb[12].mxu0 %v333_v20 }
 0x117   : > { %527 = vmatprep.mubr.f32.mxu0 %v336_v21 }
 0x11a   : > { %528 = vmatmul.mubr.f32.gmra.mrb[14].mxu0 %v335_v22 }
 0x11b   : > { %533 = vmatprep.mubr.f32.mxu0 %v338_v23 }
 0x11e   : > { %534 = vmatmul.mubr.f32.gmra.mrb[16].mxu0 %v337_v24 }
 0x11f   : > { %539 = vmatprep.mubr.f32.mxu0 %v340_v25 }
 0x122   : > { %540 = vmatmul.mubr.f32.gmra.mrb[18].mxu0 %v339_v26 }
 0x123   : > { %545 = vmatprep.mubr.f32.mxu0 %v342_v27 }
 0x126   : > { %546 = vmatmul.mubr.f32.gmra.mrb[20].mxu0 %v341_v28 }
 0x127   : > { %551 = vmatprep.mubr.f32.mxu0 %v344_v29 }
 0x12a   : > { %552 = vmatmul.mubr.f32.gmra.mrb[22].mxu0 %v343_v30 }
 0x1d1   : > { %v487_v50 = vpop.f32.mrb[0].mxu0 }
 0x1d2   : > { %v488_v51 = vadd.f32 %v487_v50, %v2845_v48  ;;  %v489_v52 = vpop.f32.mrb[1].mxu0 }
 0x1d3   : > { %v490_v53 = vadd.f32 %v489_v52, %v2847_v49 }
 0x1d4   : > { %v558_v56 = vmax.f32 %v488_v51, 0.0 }
 0x1d5   : > { %v493_v54 = vpop.f32.mrb[2].mxu0  ;;  %v559_v55 = vmax.f32 %v490_v53, 0.0 }
 0x1d6   : > { %v494_v57 = vadd.f32 %v493_v54, %v2845_v48  ;;  %v495_v58 = vpop.f32.mrb[3].mxu0 }
 0x1d7   : > { %v496_v59 = vadd.f32 %v495_v58, %v2847_v49  ;;  %685 = vmatprep.mubr.f32.mxu1 %v559_v55 }
 0x1d8   : > { %686 = vmatmul.mubr.f32.vlgmr.msra.gmra.mrb[0].mxu1 %v558_v56  ;;  %v560_v62 = vmax.f32 %v494_v57, 0.0 }
 0x1d9   : > { %v561_v60 = vmax.f32 %v496_v59, 0.0  ;;  %v499_v61 = vpop.f32.mrb[4].mxu0 }
 0x1da   : > { %v500_v63 = vadd.f32 %v499_v61, %v2845_v48  ;;  %v501_v0 = vpop.f32.mrb[5].mxu0 }
 0x1db   : > { %v502_v1 = vadd.f32 %v501_v0, %v2847_v49  ;;  %690 = vmatprep.mubr.f32.mxu1 %v561_v60 }
 0x1dc   : > { %691 = vmatmul.mubr.f32.gmra.mrb[2].mxu1 %v560_v62  ;;  %v562_v4 = vmax.f32 %v500_v63, 0.0 }
 0x1dd   : > { %v563_v2 = vmax.f32 %v502_v1, 0.0  ;;  %v505_v3 = vpop.f32.mrb[6].mxu0  ;;  %v1825_v1 = vld [vmem:[#allocation12] ss:$0 sm:$0xff] }
 0x1de   : > { %v506_v5 = vadd.f32 %v505_v3, %v2845_v48  ;;  %v507_v6 = vpop.f32.mrb[7].mxu0 }
 0x1df   : > { %v508_v7 = vadd.f32 %v507_v6, %v2847_v49  ;;  %695 = vmatprep.mubr.f32.mxu1 %v563_v2 }
 0x1e0   : > { %696 = vmatmul.mubr.f32.gmra.mrb[4].mxu1 %v562_v4  ;;  %v564_v10 = vmax.f32 %v506_v5, 0.0 }
 0x1e1   : > { %v565_v8 = vmax.f32 %v508_v7, 0.0  ;;  %v511_v9 = vpop.f32.mrb[8].mxu0 }
 0x1e2   : > { %v512_v11 = vadd.f32 %v511_v9, %v2845_v48  ;;  %v513_v12 = vpop.f32.mrb[9].mxu0 }
 0x1e3   : > { %v514_v13 = vadd.f32 %v513_v12, %v2847_v49  ;;  %700 = vmatprep.mubr.f32.mxu1 %v565_v8 }
 0x1e4   : > { %701 = vmatmul.mubr.f32.gmra.mrb[6].mxu1 %v564_v10  ;;  %v566_v16 = vmax.f32 %v512_v11, 0.0 }
 0x1e5   : > { %v567_v14 = vmax.f32 %v514_v13, 0.0  ;;  %v517_v15 = vpop.f32.mrb[10].mxu0 }
 0x1e6   : > { %v518_v17 = vadd.f32 %v517_v15, %v2845_v48  ;;  %v519_v18 = vpop.f32.mrb[11].mxu0 }
 0x1e7   : > { %v520_v19 = vadd.f32 %v519_v18, %v2847_v49  ;;  %705 = vmatprep.mubr.f32.mxu1 %v567_v14 }
 0x1e8   : > { %706 = vmatmul.mubr.f32.gmra.mrb[8].mxu1 %v566_v16  ;;  %v568_v22 = vmax.f32 %v518_v17, 0.0 }
 0x1e9   : > { %v569_v20 = vmax.f32 %v520_v19, 0.0  ;;  %v523_v21 = vpop.f32.mrb[12].mxu0 }
 0x1ea   : > { %v524_v23 = vadd.f32 %v523_v21, %v2845_v48  ;;  %v525_v24 = vpop.f32.mrb[13].mxu0 }
 0x1eb   : > { %v526_v25 = vadd.f32 %v525_v24, %v2847_v49  ;;  %710 = vmatprep.mubr.f32.mxu1 %v569_v20 }
 0x1ec   : > { %711 = vmatmul.mubr.f32.gmra.mrb[10].mxu1 %v568_v22  ;;  %v570_v28 = vmax.f32 %v524_v23, 0.0 }
 0x1ed   : > { %v571_v26 = vmax.f32 %v526_v25, 0.0  ;;  %v529_v27 = vpop.f32.mrb[14].mxu0 }
 0x1ee   : > { %v530_v29 = vadd.f32 %v529_v27, %v2845_v48  ;;  %v531_v30 = vpop.f32.mrb[15].mxu0 }
 0x1ef   : > { %v532_v31 = vadd.f32 %v531_v30, %v2847_v49  ;;  %715 = vmatprep.mubr.f32.mxu1 %v571_v26 }
 0x1f0   : > { %716 = vmatmul.mubr.f32.gmra.mrb[12].mxu1 %v570_v28  ;;  %v572_v34 = vmax.f32 %v530_v29, 0.0 }
 0x1f1   : > { %v573_v32 = vmax.f32 %v532_v31, 0.0  ;;  %v535_v33 = vpop.f32.mrb[16].mxu0 }
 0x1f2   : > { %v536_v35 = vadd.f32 %v535_v33, %v2845_v48  ;;  %v537_v36 = vpop.f32.mrb[17].mxu0 }
 0x1f3   : > { %v538_v38 = vadd.f32 %v537_v36, %v2847_v49  ;;  %720 = vmatprep.mubr.f32.mxu1 %v573_v32 }
 0x1f4   : > { %721 = vmatmul.mubr.f32.gmra.mrb[14].mxu1 %v572_v34  ;;  %v574_v41 = vmax.f32 %v536_v35, 0.0 }
 0x1f5   : > { %v575_v39 = vmax.f32 %v538_v38, 0.0  ;;  %v541_v40 = vpop.f32.mrb[18].mxu0 }
 0x1f6   : > { %v542_v45 = vadd.f32 %v541_v40, %v2845_v48  ;;  %v543_v46 = vpop.f32.mrb[19].mxu0 }
 0x1f7   : > { %v544_v47 = vadd.f32 %v543_v46, %v2847_v49  ;;  %725 = vmatprep.mubr.f32.mxu1 %v575_v39 }
 0x1f8   : > { %726 = vmatmul.mubr.f32.gmra.mrb[16].mxu1 %v574_v41  ;;  %v576_v52 = vmax.f32 %v542_v45, 0.0 }
 0x1f9   : > { %v577_v50 = vmax.f32 %v544_v47, 0.0  ;;  %v547_v51 = vpop.f32.mrb[20].mxu0 }
 0x1fa   : > { %v548_v53 = vadd.f32 %v547_v51, %v2845_v48  ;;  %v549_v54 = vpop.f32.mrb[21].mxu0 }
 0x1fb   : > { %v550_v55 = vadd.f32 %v549_v54, %v2847_v49  ;;  %730 = vmatprep.mubr.f32.mxu1 %v577_v50 }
 0x1fc   : > { %731 = vmatmul.mubr.f32.gmra.mrb[18].mxu1 %v576_v52  ;;  %v578_v58 = vmax.f32 %v548_v53, 0.0 }
 0x1fd   : > { %v579_v56 = vmax.f32 %v550_v55, 0.0  ;;  %v553_v57 = vpop.f32.mrb[22].mxu0 }
 0x1fe   : > { %v554_v59 = vadd.f32 %v553_v57, %v2845_v48  ;;  %v555_v60 = vpop.f32.mrb[23].mxu0 }
 0x1ff   : > { %v556_v61 = vadd.f32 %v555_v60, %v2847_v49  ;;  %735 = vmatprep.mubr.f32.mxu1 %v579_v56 }
 0x200   : > { %736 = vmatmul.mubr.f32.gmra.mrb[20].mxu1 %v578_v58  ;;  %v580_v63 = vmax.f32 %v554_v59, 0.0 }
 0x201   : > { %v581_v62 = vmax.f32 %v556_v61, 0.0 }
 0x203   : > { %740 = vmatprep.mubr.f32.mxu1 %v581_v62 }
 0x204   : > { %741 = vmatmul.mubr.f32.gmra.mrb[22].mxu1 %v580_v63 }
 0x2ab   : > { %v1932_v0 = vpop.f32.mrb[0].mxu1 }
 0x2ac   : > { %v1933_v2 = vpop.f32.mrb[1].mxu1 }
 0x2ad   : > { %v1934_v3 = vadd.f32 %v1933_v2, %v1932_v0 }
 0x2af   : > { %v688_v4 = vadd.f32 %v1934_v3, %v1825_v1  ;;  %v1935_v5 = vpop.f32.mrb[2].mxu1 }
 0x2b0   : > { %v1936_v6 = vpop.f32.mrb[3].mxu1 }
 0x2b1   : > { %746 = vst [vmem:[#allocation2] sm:$0xff] %v688_v4  ;;  %v1937_v7 = vadd.f32 %v1936_v6, %v1935_v5 }
 0x2b3   : > { %v693_v8 = vadd.f32 %v1937_v7, %v1825_v1  ;;  %v1938_v48 = vpop.f32.mrb[4].mxu1 }
 0x2b4   : > { %v1939_v9 = vpop.f32.mrb[5].mxu1 }
 0x2b5   : > { %747 = vst [vmem:[#allocation2 + $0x8] sm:$0xff] %v693_v8  ;;  %v1940_v49 = vadd.f32 %v1939_v9, %v1938_v48 }
 0x2b7   : > { %v698_v10 = vadd.f32 %v1940_v49, %v1825_v1  ;;  %v1941_v11 = vpop.f32.mrb[6].mxu1 }
 0x2b8   : > { %v1942_v12 = vpop.f32.mrb[7].mxu1 }
 0x2b9   : > { %748 = vst [vmem:[#allocation2 + $0x10] sm:$0xff] %v698_v10  ;;  %v1943_v13 = vadd.f32 %v1942_v12, %v1941_v11 }
 0x2bb   : > { %v703_v14 = vadd.f32 %v1943_v13, %v1825_v1  ;;  %v1944_v15 = vpop.f32.mrb[8].mxu1 }
 0x2bc   : > { %v1945_v16 = vpop.f32.mrb[9].mxu1 }
 0x2bd   : > { %749 = vst [vmem:[#allocation2 + $0x18] sm:$0xff] %v703_v14  ;;  %v1946_v17 = vadd.f32 %v1945_v16, %v1944_v15 }
 0x2bf   : > { %v708_v18 = vadd.f32 %v1946_v17, %v1825_v1  ;;  %v1947_v19 = vpop.f32.mrb[10].mxu1 }
 0x2c0   : > { %v1948_v20 = vpop.f32.mrb[11].mxu1 }
 0x2c1   : > { %750 = vst [vmem:[#allocation2 + $0x20] sm:$0xff] %v708_v18  ;;  %v1949_v21 = vadd.f32 %v1948_v20, %v1947_v19 }
 0x2c3   : > { %v713_v22 = vadd.f32 %v1949_v21, %v1825_v1  ;;  %v1950_v23 = vpop.f32.mrb[12].mxu1 }
 0x2c4   : > { %v1951_v24 = vpop.f32.mrb[13].mxu1 }
 0x2c5   : > { %751 = vst [vmem:[#allocation2 + $0x28] sm:$0xff] %v713_v22  ;;  %v1952_v25 = vadd.f32 %v1951_v24, %v1950_v23 }
 0x2c7   : > { %v718_v26 = vadd.f32 %v1952_v25, %v1825_v1  ;;  %v1953_v27 = vpop.f32.mrb[14].mxu1 }
 0x2c8   : > { %v1954_v28 = vpop.f32.mrb[15].mxu1 }
 0x2c9   : > { %752 = vst [vmem:[#allocation2 + $0x30] sm:$0xff] %v718_v26  ;;  %v1955_v29 = vadd.f32 %v1954_v28, %v1953_v27 }
 0x2cb   : > { %v723_v30 = vadd.f32 %v1955_v29, %v1825_v1  ;;  %v1956_v31 = vpop.f32.mrb[16].mxu1 }
 0x2cc   : > { %v1957_v32 = vpop.f32.mrb[17].mxu1 }
 0x2cd   : > { %753 = vst [vmem:[#allocation2 + $0x38] sm:$0xff] %v723_v30  ;;  %v1958_v33 = vadd.f32 %v1957_v32, %v1956_v31 }
 0x2cf   : > { %v728_v34 = vadd.f32 %v1958_v33, %v1825_v1  ;;  %v1959_v35 = vpop.f32.mrb[18].mxu1 }
 0x2d0   : > { %v1960_v36 = vpop.f32.mrb[19].mxu1 }
 0x2d1   : > { %754 = vst [vmem:[#allocation2 + $0x40] sm:$0xff] %v728_v34  ;;  %v1961_v38 = vadd.f32 %v1960_v36, %v1959_v35 }
 0x2d3   : > { %v733_v39 = vadd.f32 %v1961_v38, %v1825_v1  ;;  %v1962_v40 = vpop.f32.mrb[20].mxu1 }
 0x2d4   : > { %v1963_v41 = vpop.f32.mrb[21].mxu1 }
 0x2d5   : > { %755 = vst [vmem:[#allocation2 + $0x48] sm:$0xff] %v733_v39  ;;  %v1964_v45 = vadd.f32 %v1963_v41, %v1962_v40 }
 0x2d7   : > { %v738_v46 = vadd.f32 %v1964_v45, %v1825_v1  ;;  %v1965_v47 = vpop.f32.mrb[22].mxu1 }
 0x2d8   : > { %v1966_v50 = vpop.f32.mrb[23].mxu1 }
 0x2d9   : > { %756 = vst [vmem:[#allocation2 + $0x50] sm:$0xff] %v738_v46  ;;  %v1967_v51 = vadd.f32 %v1966_v50, %v1965_v47 }
 0x2db   : > { %v743_v52 = vadd.f32 %v1967_v51, %v1825_v1 }
 0x2dd   : > { %757 = vst [vmem:[#allocation2 + $0x58] sm:$0xff] %v743_v52 }
 0x2de LB: >> { %s769_s22 = smul.u32 3, %s2603_s29  ;;  %s2499_s16 = sphi %s2877_s16, %s768_s16  }
 0x2e0   : >> { %s2886_s25 = sadd.s32 %s2499_s16, %s769_s22 }
 0x2e1   : >> { %p1826_p0 = scmp.ge.s32.totalorder %s2886_s25, 5 }
 0x2e2   : >> { %s1827_s15 = sshll.u32 (!%p1826_p0), %s2499_s16, 5  ;;  %v2545_v57 = vmov (!%p1826_p0), 0.0   ;;  %s821_s28 = sld [smem:[#allocation4 + %s2886_s25]] (!%p1826_p0)  ;;  %vm1039_vm4 = vcmask (!%p1826_p0), 261120  }
 0x2e3   : >> { %774 = sbr.rel (%p1826_p0) target bundleno = 1593 (0x639), region = 71  ;;  %s776_s18 = scalar_lea.vmem (!%p1826_p0), [#allocation2], %s1827_s15  ;;  %1200 = vmatprep.mubr.f32.mxu0 (!%p1826_p0), %v2545_v57  ;;  %1296 = vmatprep.mubr.f32.mxu1 (!%p1826_p0), %v2545_v57 }
 0x2e4   : >> { %v777_v53 = vld [vmem:[%s776_s18] sm:$0xff] (!%p1826_p0)  ;;  %v779_v54 = vld [vmem:[%s776_s18 + $0x10] sm:$0xff] (!%p1826_p0)  ;;  %v778_v55 = vld [vmem:[%s776_s18 + $0x8] sm:$0xff] (!%p1826_p0)  ;;  %s874_s8 = sshra.s32 (!%p1826_p0), %s1827_s15, 3  ;;  %s1891_s14 = sshll.u32 (!%p1826_p0), %s2499_s16, 9 }
 0x2e5   : >> { %781 = vmax.xlane.f32.xlu0 (!%p1826_p0), %v777_v53  ;;  %785 = vmax.xlane.f32.xlu1 (!%p1826_p0), %v779_v54  ;;  %v780_v56 = vld [vmem:[%s776_s18 + $0x18] sm:$0xff] (!%p1826_p0)  ;;  %s1890_s24 = sshll.u32 (!%p1826_p0), %s874_s8, 4  ;;  %s3002_s19 = scalar_lea.vmem (!%p1826_p0), %s2875_s11, %s1891_s14 [#allocation13] }
 0x2e6   : >> { %s878_s2 = scalar_lea.vmem (!%p1826_p0), %s2793_s17, %s1890_s24 [#allocation5] }
 0x2e8   : >> { %v822_v14 = vstv (!%p1826_p0), %s821_s28 }
 0x2e9   : >> { %783 = vmax.xlane.f32.xlu0 (!%p1826_p0), %v778_v55  ;;  %787 = vmax.xlane.f32.xlu1 (!%p1826_p0), %v780_v56  ;;  %vm824_vm0 = vcmp.lt.s32.totalorder (!%p1826_p0), %v2835_v42, %v822_v14  ;;  %vm823_vm1 = vcmp.lt.s32.totalorder (!%p1826_p0), %v2832_v37, %v822_v14  ;;  %vm825_vm2 = vcmp.lt.s32.totalorder (!%p1826_p0), %v2838_v43, %v822_v14 }
 0x2ea   : >> { %vm826_vm3 = vcmp.lt.s32.totalorder %v2841_v44, %v822_v14  ;;  %v1829_v21 = vsel %vm824_vm0, 1.0, %v2545_v57  ;;  %v1828_v25 = vsel %vm823_vm1, 1.0, %v2545_v57  ;;  %v1830_v26 = vsel %vm825_vm2, 1.0, %v2545_v57 }
 0x2eb   : >> { %v1831_v27 = vsel %vm826_vm3, 1.0, %v2545_v57 }
 0x372   : >> { %v782_v58 = vpop.xlane.xlu0 %781  ;;  %v786_v59 = vpop.xlane.xlu1 %785 }
 0x373   : >> { %v789_v60 = vsub.f32 %v777_v53, %v782_v58  ;;  %v791_v61 = vsub.f32 %v779_v54, %v786_v59 }
 0x375   : >> { %v793_v62 = vmul.f32 1.442695, %v789_v60  ;;  %v797_v63 = vmul.f32 1.442695, %v791_v61 }
 0x376   : >> { %v784_v0 = vpop.xlane.xlu0 %783  ;;  %v788_v1 = vpop.xlane.xlu1 %787 }
 0x377   : >> { %2233 = vpow2.f32 %v793_v62  ;;  %v790_v2 = vsub.f32 %v778_v55, %v784_v0  ;;  %v792_v3 = vsub.f32 %v780_v56, %v788_v1 }
 0x378   : >> { %2235 = vpow2.f32 %v797_v63 }
 0x379   : >> { %v795_v4 = vmul.f32 1.442695, %v790_v2  ;;  %v799_v5 = vmul.f32 1.442695, %v792_v3 }
 0x37b   : >> { %2237 = vpow2.f32 %v795_v4 }
 0x37c   : >> { %2239 = vpow2.f32 %v799_v5 }
 0x381   : >> { %v2234_v6 = vpop.eup %2233 }
 0x382   : >> { %801 = vadd.xlane.f32.xlu0 %v2234_v6  ;;  %v2236_v7 = vpop.eup %2235 }
 0x385   : >> { %v2238_v8 = vpop.eup %2237 }
 0x386   : >> { %805 = vadd.xlane.f32.xlu0 %v2236_v7  ;;  %803 = vadd.xlane.f32.xlu1 %v2238_v8  ;;  %v2240_v48 = vpop.eup %2239  ;;  %v880_v7 = vld [vmem:[%s878_s2 + $0x8] sm:$0xff]  ;;  %v882_v8 = vld [vmem:[%s878_s2 + $0x18] sm:$0xff] }
 0x38a   : >> { %807 = vadd.xlane.f32.xlu1 %v2240_v48 }
 0x40f   : >> { %v802_v9 = vpop.xlane.xlu0 %801 }
 0x410   : >> { %2241 = vlog2.f32 %v802_v9 }
 0x413   : >> { %v804_v49 = vpop.xlane.xlu1 %803  ;;  %v806_v10 = vpop.xlane.xlu0 %805 }
 0x414   : >> { %2243 = vlog2.f32 %v804_v49 }
 0x415   : >> { %2245 = vlog2.f32 %v806_v10  ;;  %v879_v10 = vld [vmem:[%s878_s2] sm:$0xff] }
 0x417   : >> { %v808_v11 = vpop.xlane.xlu1 %807 }
 0x418   : >> { %2247 = vlog2.f32 %v808_v11  ;;  %v881_v11 = vld [vmem:[%s878_s2 + $0x10] sm:$0xff] }
 0x41a   : >> { %v2242_v12 = vpop.eup %2241 }
 0x41b   : >> { %v810_v16 = vmul.f32 0.6931472, %v2242_v12  ;;  %v884_v12 = vld [vmem:[%s878_s2 + $0x28] sm:$0xff] }
 0x41d   : >> { %v817_v22 = vadd.f32 %v810_v16, %v782_v58  ;;  %v883_v16 = vld [vmem:[%s878_s2 + $0x20] sm:$0xff] }
 0x41e   : >> { %v2244_v13 = vpop.eup %2243 }
 0x41f   : >> { %v2246_v15 = vpop.eup %2245  ;;  %v812_v17 = vmul.f32 0.6931472, %v2244_v13  ;;  %v835_v30 = vadd.f32 %v1828_v25, %v817_v22  ;;  %v885_v22 = vld [vmem:[%s878_s2 + $0x30] sm:$0xff] }
 0x420   : >> { %v814_v18 = vmul.f32 0.6931472, %v2246_v15 }
 0x421   : >> { %v818_v19 = vadd.f32 %v812_v17, %v784_v0  ;;  %v886_v17 = vld [vmem:[%s878_s2 + $0x38] sm:$0xff] }
 0x422   : >> { %v2248_v20 = vpop.eup %2247  ;;  %v819_v23 = vadd.f32 %v814_v18, %v786_v59 }
 0x423   : >> { %v816_v24 = vmul.f32 0.6931472, %v2248_v20  ;;  %v836_v28 = vadd.f32 %v1829_v21, %v818_v19 }
 0x424   : >> { %v837_v31 = vadd.f32 %v1830_v26, %v819_v23 }
 0x425   : >> { %v820_v29 = vadd.f32 %v816_v24, %v788_v1  ;;  %v839_v33 = vmax.f32 %v835_v30, %v836_v28 }
 0x427   : >> { %v838_v32 = vadd.f32 %v1831_v27, %v820_v29 }
 0x429   : >> { %v840_v34 = vmax.f32 %v837_v31, %v838_v32 }
 0x42b   : >> { %v841_v35 = vmax.f32 %v839_v33, %v840_v34 }
 0x42d   : >> { %v842_v36 = vrot.slane %v841_v35, 4 }
 0x42f   : >> { %v843_v38 = vmax.f32 %v841_v35, %v842_v36 }
 0x431   : >> { %v844_v39 = vrot.slane %v843_v38, 2 }
 0x433   : >> { %v845_v40 = vmax.f32 %v843_v38, %v844_v39 }
 0x435   : >> { %v846_v41 = vrot.slane %v845_v40, 1 }
 0x437   : >> { %v847_v45 = vmax.f32 %v845_v40, %v846_v41 }
 0x439   : >> { %v848_v46 = vsub.f32 %v835_v30, %v847_v45  ;;  %v849_v47 = vsub.f32 %v836_v28, %v847_v45  ;;  %v850_v50 = vsub.f32 %v837_v31, %v847_v45  ;;  %v851_v51 = vsub.f32 %v838_v32, %v847_v45 }
 0x43b   : >> { %v852_v52 = vmul.f32 1.442695, %v848_v46  ;;  %v854_v53 = vmul.f32 1.442695, %v849_v47  ;;  %v856_v54 = vmul.f32 1.442695, %v850_v50 }
 0x43c   : >> { %v858_v55 = vmul.f32 1.442695, %v851_v51 }
 0x43d   : >> { %2249 = vpow2.f32 %v852_v52 }
 0x43e   : >> { %2251 = vpow2.f32 %v854_v53 }
 0x43f   : >> { %2253 = vpow2.f32 %v856_v54 }
 0x440   : >> { %2255 = vpow2.f32 %v858_v55 }
 0x447   : >> { %v2250_v56 = vpop.eup %2249 }
 0x448   : >> { %v2252_v58 = vpop.eup %2251 }
 0x449   : >> { %v860_v59 = vadd.f32 %v2252_v58, %v2250_v56  ;;  %v2254_v60 = vpop.eup %2253 }
 0x44a   : >> { %v2256_v62 = vpop.eup %2255 }
 0x44b   : >> { %v861_v61 = vadd.f32 %v2254_v60, %v860_v59 }
 0x44d   : >> { %v862_v63 = vadd.f32 %v2256_v62, %v861_v61 }
 0x44f   : >> { %v863_v0 = vrot.slane %v862_v63, 4 }
 0x451   : >> { %v864_v1 = vadd.f32 %v863_v0, %v862_v63 }
 0x453   : >> { %v865_v2 = vrot.slane %v864_v1, 2 }
 0x455   : >> { %v866_v3 = vadd.f32 %v865_v2, %v864_v1 }
 0x457   : >> { %v867_v4 = vrot.slane %v866_v3, 1 }
 0x459   : >> { %v868_v5 = vadd.f32 %v867_v4, %v866_v3 }
 0x45b   : >> { %2257 = vrcp.f32 %v868_v5 }
 0x465   : >> { %v2258_v6 = vpop.eup %2257 }
 0x466   : >> { %v2906_v48 = vmul.f32 %v2258_v6, %v2250_v56  ;;  %v2908_v9 = vmul.f32 %v2258_v6, %v2252_v58  ;;  %v2910_v49 = vmul.f32 %v2258_v6, %v2254_v60  ;;  %v2912_v13 = vmul.f32 %v2258_v6, %v2256_v62 }
 0x468   : >> { %v888_v14 = vmul.f32 %v880_v7, %v2906_v48  ;;  %v890_v15 = vmul.f32 %v882_v8, %v2908_v9  ;;  %v887_v18 = vmul.f32 %v879_v10, %v2906_v48  ;;  %v889_v19 = vmul.f32 %v881_v11, %v2908_v9 }
 0x469   : >> { %v892_v20 = vmul.f32 %v884_v12, %v2910_v49  ;;  %v891_v23 = vmul.f32 %v883_v16, %v2910_v49  ;;  %v894_v25 = vmul.f32 %v886_v17, %v2912_v13  ;;  %v893_v27 = vmul.f32 %v885_v22, %v2912_v13 }
 0x46a   : >> { %v904_v21 = vadd.f32 %v890_v15, %v888_v14  ;;  %v895_v24 = vadd.f32 %v889_v19, %v887_v18 }
 0x46c   : >> { %v905_v26 = vadd.f32 %v904_v21, %v892_v20  ;;  %v896_v28 = vadd.f32 %v895_v24, %v891_v23 }
 0x46e   : >> { %v906_v29 = vadd.f32 %v905_v26, %v894_v25  ;;  %v897_v30 = vadd.f32 %v896_v28, %v893_v27 }
 0x470   : >> { %v907_v31 = vrot.slane %v906_v29, 4  ;;  %v898_v32 = vrot.slane %v897_v30, 4 }
 0x472   : >> { %v908_v33 = vadd.f32 %v907_v31, %v906_v29  ;;  %v899_v34 = vadd.f32 %v898_v32, %v897_v30 }
 0x474   : >> { %v909_v35 = vrot.slane %v908_v33, 2  ;;  %v900_v36 = vrot.slane %v899_v34, 2 }
 0x476   : >> { %v910_v38 = vadd.f32 %v909_v35, %v908_v33  ;;  %v901_v39 = vadd.f32 %v900_v36, %v899_v34 }
 0x478   : >> { %v911_v40 = vrot.slane %v910_v38, 1  ;;  %v902_v41 = vrot.slane %v901_v39, 1 }
 0x47a   : >> { %v912_v45 = vadd.f32 %v911_v40, %v910_v38  ;;  %v903_v46 = vadd.f32 %v902_v41, %v901_v39 }
 0x47c   : >> { %v914_v47 = vsub.f32 %v880_v7, %v912_v45  ;;  %v916_v50 = vsub.f32 %v882_v8, %v912_v45  ;;  %v918_v51 = vsub.f32 %v884_v12, %v912_v45  ;;  %v920_v52 = vsub.f32 %v886_v17, %v912_v45 }
 0x47d   : >> { %v913_v53 = vsub.f32 %v879_v10, %v903_v46  ;;  %v915_v54 = vsub.f32 %v881_v11, %v903_v46  ;;  %v917_v55 = vsub.f32 %v883_v16, %v903_v46  ;;  %v919_v56 = vsub.f32 %v885_v22, %v903_v46 }
 0x47e   : >> { %v922_v58 = vmul.f32 %v914_v47, %v2906_v48  ;;  %v924_v59 = vmul.f32 %v916_v50, %v2908_v9  ;;  %v926_v60 = vmul.f32 %v918_v51, %v2910_v49  ;;  %v928_v0 = vmul.f32 %v920_v52, %v2912_v13 }
 0x47f   : >> { %v921_v61 = vmul.f32 %v913_v53, %v2906_v48  ;;  %v923_v62 = vmul.f32 %v915_v54, %v2908_v9  ;;  %v925_v63 = vmul.f32 %v917_v55, %v2910_v49  ;;  %v927_v3 = vmul.f32 %v919_v56, %v2912_v13 }
 0x480   : >> { %v930_v1 = vmul.f32 %v922_v58, %v914_v47  ;;  %v932_v2 = vmul.f32 %v924_v59, %v916_v50  ;;  %v934_v6 = vmul.f32 %v926_v60, %v918_v51  ;;  %v936_v11 = vmul.f32 %v928_v0, %v920_v52 }
 0x481   : >> { %v929_v4 = vmul.f32 %v921_v61, %v913_v53  ;;  %v931_v5 = vmul.f32 %v923_v62, %v915_v54  ;;  %v933_v8 = vmul.f32 %v925_v63, %v917_v55  ;;  %v935_v14 = vmul.f32 %v927_v3, %v919_v56 }
 0x482   : >> { %v946_v7 = vadd.f32 %v932_v2, %v930_v1 }
 0x483   : >> { %v937_v10 = vadd.f32 %v931_v5, %v929_v4 }
 0x484   : >> { %v947_v12 = vadd.f32 %v946_v7, %v934_v6 }
 0x485   : >> { %v938_v15 = vadd.f32 %v937_v10, %v933_v8 }
 0x486   : >> { %v948_v16 = vadd.f32 %v947_v12, %v936_v11 }
 0x487   : >> { %v939_v17 = vadd.f32 %v938_v15, %v935_v14 }
 0x488   : >> { %v949_v18 = vrot.slane %v948_v16, 4 }
 0x489   : >> { %v940_v19 = vrot.slane %v939_v17, 4 }
 0x48a   : >> { %v950_v20 = vadd.f32 %v949_v18, %v948_v16 }
 0x48b   : >> { %v941_v21 = vadd.f32 %v940_v19, %v939_v17 }
 0x48c   : >> { %v951_v22 = vrot.slane %v950_v20, 2 }
 0x48d   : >> { %v942_v23 = vrot.slane %v941_v21, 2 }
 0x48e   : >> { %v952_v24 = vadd.f32 %v951_v22, %v950_v20 }
 0x48f   : >> { %v943_v25 = vadd.f32 %v942_v23, %v941_v21 }
 0x490   : >> { %v953_v26 = vrot.slane %v952_v24, 1 }
 0x491   : >> { %v944_v27 = vrot.slane %v943_v25, 1 }
 0x492   : >> { %v954_v28 = vadd.f32 %v953_v26, %v952_v24 }
 0x493   : >> { %v945_v29 = vadd.f32 %v944_v27, %v943_v25 }
 0x494   : >> { %v956_v30 = vadd.f32 1e-09, %v954_v28 }
 0x495   : >> { %v955_v31 = vadd.f32 1e-09, %v945_v29 }
 0x496   : >> { %2259 = vrsqrt.f32 %v956_v30 }
 0x497   : >> { %2261 = vrsqrt.f32 %v955_v31 }
 0x4a0   : >> { %v2260_v32 = vpop.eup %2259 }
 0x4a1   : >> { %v2262_v33 = vpop.eup %2261  ;;  %v960_v34 = vmul.f32 %v2260_v32, %v914_v47  ;;  %v962_v35 = vmul.f32 %v2260_v32, %v916_v50  ;;  %v964_v36 = vmul.f32 %v2260_v32, %v918_v51  ;;  %v966_v38 = vmul.f32 %v2260_v32, %v920_v52 }
 0x4a2   : >> { %v959_v39 = vmul.f32 %v2262_v33, %v913_v53  ;;  %v961_v40 = vmul.f32 %v2262_v33, %v915_v54  ;;  %v963_v41 = vmul.f32 %v2262_v33, %v917_v55  ;;  %v965_v45 = vmul.f32 %v2262_v33, %v919_v56 }
 0x4a3   : >> { %v2064_v46 = vpack.c.bf16 %v962_v35, %v960_v34  ;;  %v968_v58 = vmul.f32 %v960_v34, %v2906_v48  ;;  %v970_v59 = vmul.f32 %v962_v35, %v2908_v9  ;;  %v972_v47 = vmul.f32 %v964_v36, %v2910_v49 }
 0x4a4   : >> { %v967_v60 = vmul.f32 %v959_v39, %v2906_v48  ;;  %v2066_v61 = vpack.c.bf16 %v961_v40, %v959_v39  ;;  %v969_v62 = vmul.f32 %v961_v40, %v2908_v9  ;;  %v971_v50 = vmul.f32 %v963_v41, %v2910_v49 }
 0x4a5   : >> { %2065 = vmatprep.subr.bf16.mxu0 %v2064_v46  ;;  %2072 = vmatprep.subr.bf16.mxu1 %v2064_v46  ;;  %v974_v51 = vmul.f32 %v966_v38, %v2912_v13  ;;  %v2068_v52 = vpack.c.bf16 %v966_v38, %v964_v36  ;;  %v973_v53 = vmul.f32 %v965_v45, %v2912_v13 }
 0x4a6   : >> { %1007 = vxpose.xlu1.b32.start [1/4] (short) %v968_v58, 128  ;;  %975 = vxpose.xlu0.b32.start [1/4] (short) %v967_v60, 128  ;;  %v2070_v48 = vpack.c.bf16 %v965_v45, %v963_v41 }
 0x4a7   : >> { %2067 = vmatpush1.bf16.msra.mxu0 %v2066_v61  ;;  %2074 = vmatpush1.bf16.msra.mxu1 %v2066_v61 }
 0x4a8   : >> { %2069 = vmatprep.subr.bf16.mxu0 %v2068_v52  ;;  %2073 = vmatprep.subr.bf16.mxu1 %v2068_v52 }
 0x4aa   : >> { %1008 = vxpose.xlu1.b32.cont [2/4] (short) %v970_v59, 128  ;;  %976 = vxpose.xlu0.b32.cont [2/4] (short) %v969_v62, 128 }
 0x4ab   : >> { %2071 = vmatpush1.bf16.msra.mxu0 %v2070_v48  ;;  %2075 = vmatpush1.bf16.msra.mxu1 %v2070_v48 }
 0x4ae   : >> { %1009 = vxpose.xlu1.b32.cont [3/4] (short) %v972_v47, 128  ;;  %977 = vxpose.xlu0.b32.cont [3/4] (short) %v971_v50, 128 }
 0x4b2   : >> { %1010 = vxpose.xlu1.b32.end [4/4] (short) %v974_v51, 128  ;;  %978 = vxpose.xlu0.b32.end [4/4] (short) %v973_v53, 128 }
 0x526   : >> { %v1023_v9 = vpop.trf.xlu1  ;;  %v991_v49 = vpop.trf.xlu0 }
 0x527   : >> { %1834 = vmatmul.mubr.msk.f32.vlgmr.msra.gmra.mrb[0].mxu0 %vm1039_vm4, %v991_v49  ;;  %1850 = vmatmul.mubr.msk.f32.vlgmr.msra.gmra.mrb[0].mxu1 %vm1039_vm4, %v1023_v9 }
 0x528   : >> { %1206 = vmatprep.mubr.f32.mxu0 %v2545_v57  ;;  %1302 = vmatprep.mubr.f32.mxu1 %v2545_v57 }
 0x52a   : >> { %v1024_v13 = vpop.trf.xlu1  ;;  %v992_v54 = vpop.trf.xlu0 }
 0x52b   : >> { %1835 = vmatmul.mubr.msk.f32.gmra.mrb[2].mxu0 %vm1039_vm4, %v992_v54  ;;  %1851 = vmatmul.mubr.msk.f32.gmra.mrb[2].mxu1 %vm1039_vm4, %v1024_v13 }
 0x52c   : >> { %1212 = vmatprep.mubr.f32.mxu0 %v2545_v57  ;;  %1308 = vmatprep.mubr.f32.mxu1 %v2545_v57 }
 0x52e   : >> { %v1025_v55 = vpop.trf.xlu1  ;;  %v993_v56 = vpop.trf.xlu0 }
 0x52f   : >> { %1836 = vmatmul.mubr.msk.f32.gmra.mrb[4].mxu0 %vm1039_vm4, %v993_v56  ;;  %1852 = vmatmul.mubr.msk.f32.gmra.mrb[4].mxu1 %vm1039_vm4, %v1025_v55 }
 0x530   : >> { %1218 = vmatprep.mubr.f32.mxu0 %v2545_v57  ;;  %1314 = vmatprep.mubr.f32.mxu1 %v2545_v57 }
 0x532   : >> { %v1026_v63 = vpop.trf.xlu1  ;;  %v994_v0 = vpop.trf.xlu0 }
 0x533   : >> { %1837 = vmatmul.mubr.msk.f32.gmra.mrb[6].mxu0 %vm1039_vm4, %v994_v0  ;;  %1853 = vmatmul.mubr.msk.f32.gmra.mrb[6].mxu1 %vm1039_vm4, %v1026_v63 }
 0x534   : >> { %1224 = vmatprep.mubr.f32.mxu0 %v2545_v57  ;;  %1320 = vmatprep.mubr.f32.mxu1 %v2545_v57 }
 0x536   : >> { %v1027_v1 = vpop.trf.xlu1  ;;  %v995_v2 = vpop.trf.xlu0 }
 0x537   : >> { %1838 = vmatmul.mubr.msk.f32.gmra.mrb[8].mxu0 %vm1039_vm4, %v995_v2  ;;  %1854 = vmatmul.mubr.msk.f32.gmra.mrb[8].mxu1 %vm1039_vm4, %v1027_v1 }
 0x538   : >> { %1230 = vmatprep.mubr.f32.mxu0 %v2545_v57  ;;  %1326 = vmatprep.mubr.f32.mxu1 %v2545_v57 }
 0x53a   : >> { %v1028_v3 = vpop.trf.xlu1  ;;  %v996_v4 = vpop.trf.xlu0 }
 0x53b   : >> { %1839 = vmatmul.mubr.msk.f32.gmra.mrb[10].mxu0 %vm1039_vm4, %v996_v4  ;;  %1855 = vmatmul.mubr.msk.f32.gmra.mrb[10].mxu1 %vm1039_vm4, %v1028_v3 }
 0x53c   : >> { %1236 = vmatprep.mubr.f32.mxu0 %v2545_v57  ;;  %1332 = vmatprep.mubr.f32.mxu1 %v2545_v57 }
 0x53e   : >> { %v1029_v5 = vpop.trf.xlu1  ;;  %v997_v6 = vpop.trf.xlu0 }
 0x53f   : >> { %1840 = vmatmul.mubr.msk.f32.gmra.mrb[12].mxu0 %vm1039_vm4, %v997_v6  ;;  %1856 = vmatmul.mubr.msk.f32.gmra.mrb[12].mxu1 %vm1039_vm4, %v1029_v5 }
 0x540   : >> { %1242 = vmatprep.mubr.f32.mxu0 %v2545_v57  ;;  %1338 = vmatprep.mubr.f32.mxu1 %v2545_v57 }
 0x542   : >> { %v1030_v7 = vpop.trf.xlu1  ;;  %v998_v8 = vpop.trf.xlu0 }
 0x543   : >> { %1841 = vmatmul.mubr.msk.f32.gmra.mrb[14].mxu0 %vm1039_vm4, %v998_v8  ;;  %1857 = vmatmul.mubr.msk.f32.gmra.mrb[14].mxu1 %vm1039_vm4, %v1030_v7 }
 0x544   : >> { %1248 = vmatprep.mubr.f32.mxu0 %v2545_v57  ;;  %1344 = vmatprep.mubr.f32.mxu1 %v2545_v57 }
 0x546   : >> { %v1031_v10 = vpop.trf.xlu1  ;;  %v999_v11 = vpop.trf.xlu0 }
 0x547   : >> { %1842 = vmatmul.mubr.msk.f32.gmra.mrb[16].mxu0 %vm1039_vm4, %v999_v11  ;;  %1858 = vmatmul.mubr.msk.f32.gmra.mrb[16].mxu1 %vm1039_vm4, %v1031_v10 }
 0x548   : >> { %1254 = vmatprep.mubr.f32.mxu0 %v2545_v57  ;;  %1350 = vmatprep.mubr.f32.mxu1 %v2545_v57 }
 0x54a   : >> { %v1032_v12 = vpop.trf.xlu1  ;;  %v1000_v14 = vpop.trf.xlu0 }
 0x54b   : >> { %1843 = vmatmul.mubr.msk.f32.gmra.mrb[18].mxu0 %vm1039_vm4, %v1000_v14  ;;  %1859 = vmatmul.mubr.msk.f32.gmra.mrb[18].mxu1 %vm1039_vm4, %v1032_v12 }
 0x54c   : >> { %1260 = vmatprep.mubr.f32.mxu0 %v2545_v57  ;;  %1356 = vmatprep.mubr.f32.mxu1 %v2545_v57 }
 0x54e   : >> { %v1033_v15 = vpop.trf.xlu1  ;;  %v1001_v16 = vpop.trf.xlu0 }
 0x54f   : >> { %1844 = vmatmul.mubr.msk.f32.gmra.mrb[20].mxu0 %vm1039_vm4, %v1001_v16  ;;  %1860 = vmatmul.mubr.msk.f32.gmra.mrb[20].mxu1 %vm1039_vm4, %v1033_v15 }
 0x550   : >> { %1266 = vmatprep.mubr.f32.mxu0 %v2545_v57  ;;  %1362 = vmatprep.mubr.f32.mxu1 %v2545_v57 }
 0x552   : >> { %v1034_v17 = vpop.trf.xlu1  ;;  %v1002_v18 = vpop.trf.xlu0 }
 0x553   : >> { %1845 = vmatmul.mubr.msk.f32.gmra.mrb[22].mxu0 %vm1039_vm4, %v1002_v18  ;;  %1861 = vmatmul.mubr.msk.f32.gmra.mrb[22].mxu1 %vm1039_vm4, %v1034_v17 }
 0x554   : >> { %1272 = vmatprep.mubr.f32.mxu0 %v2545_v57  ;;  %1368 = vmatprep.mubr.f32.mxu1 %v2545_v57 }
 0x556   : >> { %v1035_v19 = vpop.trf.xlu1  ;;  %v1003_v20 = vpop.trf.xlu0 }
 0x557   : >> { %1846 = vmatmul.mubr.msk.f32.gmra.mrb[24].mxu0 %vm1039_vm4, %v1003_v20  ;;  %1862 = vmatmul.mubr.msk.f32.gmra.mrb[24].mxu1 %vm1039_vm4, %v1035_v19 }
 0x558   : >> { %1278 = vmatprep.mubr.f32.mxu0 %v2545_v57  ;;  %1374 = vmatprep.mubr.f32.mxu1 %v2545_v57 }
 0x55a   : >> { %v1036_v21 = vpop.trf.xlu1  ;;  %v1004_v22 = vpop.trf.xlu0 }
 0x55b   : >> { %1847 = vmatmul.mubr.msk.f32.gmra.mrb[26].mxu0 %vm1039_vm4, %v1004_v22  ;;  %1863 = vmatmul.mubr.msk.f32.gmra.mrb[26].mxu1 %vm1039_vm4, %v1036_v21 }
 0x55c   : >> { %1284 = vmatprep.mubr.f32.mxu0 %v2545_v57  ;;  %1380 = vmatprep.mubr.f32.mxu1 %v2545_v57 }
 0x55e   : >> { %v1037_v23 = vpop.trf.xlu1  ;;  %v1005_v24 = vpop.trf.xlu0 }
 0x55f   : >> { %1848 = vmatmul.mubr.msk.f32.gmra.mrb[28].mxu0 %vm1039_vm4, %v1005_v24  ;;  %1864 = vmatmul.mubr.msk.f32.gmra.mrb[28].mxu1 %vm1039_vm4, %v1037_v23 }
 0x560   : >> { %1290 = vmatprep.mubr.f32.mxu0 %v2545_v57  ;;  %1386 = vmatprep.mubr.f32.mxu1 %v2545_v57 }
 0x562   : >> { %v1038_v25 = vpop.trf.xlu1  ;;  %v1006_v26 = vpop.trf.xlu0 }
 0x563   : >> { %1849 = vmatmul.mubr.msk.f32.gmra.mrb[30].mxu0 %vm1039_vm4, %v1006_v26  ;;  %1865 = vmatmul.mubr.msk.f32.gmra.mrb[30].mxu1 %vm1039_vm4, %v1038_v25 }
 0x5fa   : >> { %v1202_v27 = vpop.f32.mrb[0].mxu0  ;;  %v1298_v28 = vpop.f32.mrb[0].mxu1 }
 0x5fb   : >> { %1396 = vst [vmem:[%s3002_s19] sm:$0xff] %v1202_v27  ;;  %1428 = vst [vmem:[%s3002_s19 + $0x100] sm:$0xff] %v1298_v28  ;;  %v1204_v57 = vpop.f32.mrb[1].mxu0  ;;  %v1300_v29 = vpop.f32.mrb[1].mxu1 }
 0x5fc   : >> { %1397 = vst [vmem:[%s3002_s19 + $0x8] sm:$0xff] %v1204_v57  ;;  %1429 = vst [vmem:[%s3002_s19 + $0x108] sm:$0xff] %v1300_v29 }
 0x5fe   : >> { %v1208_v30 = vpop.f32.mrb[2].mxu0  ;;  %v1304_v31 = vpop.f32.mrb[2].mxu1 }
 0x5ff   : >> { %1398 = vst [vmem:[%s3002_s19 + $0x10] sm:$0xff] %v1208_v30  ;;  %1430 = vst [vmem:[%s3002_s19 + $0x110] sm:$0xff] %v1304_v31  ;;  %v1210_v32 = vpop.f32.mrb[3].mxu0  ;;  %v1306_v33 = vpop.f32.mrb[3].mxu1 }
 0x600   : >> { %1399 = vst [vmem:[%s3002_s19 + $0x18] sm:$0xff] %v1210_v32  ;;  %1431 = vst [vmem:[%s3002_s19 + $0x118] sm:$0xff] %v1306_v33 }
 0x602   : >> { %v1214_v34 = vpop.f32.mrb[4].mxu0  ;;  %v1310_v35 = vpop.f32.mrb[4].mxu1 }
 0x603   : >> { %1400 = vst [vmem:[%s3002_s19 + $0x20] sm:$0xff] %v1214_v34  ;;  %1432 = vst [vmem:[%s3002_s19 + $0x120] sm:$0xff] %v1310_v35  ;;  %v1216_v36 = vpop.f32.mrb[5].mxu0  ;;  %v1312_v38 = vpop.f32.mrb[5].mxu1 }
 0x604   : >> { %1401 = vst [vmem:[%s3002_s19 + $0x28] sm:$0xff] %v1216_v36  ;;  %1433 = vst [vmem:[%s3002_s19 + $0x128] sm:$0xff] %v1312_v38 }
 0x606   : >> { %v1220_v39 = vpop.f32.mrb[6].mxu0  ;;  %v1316_v40 = vpop.f32.mrb[6].mxu1 }
 0x607   : >> { %1402 = vst [vmem:[%s3002_s19 + $0x30] sm:$0xff] %v1220_v39  ;;  %1434 = vst [vmem:[%s3002_s19 + $0x130] sm:$0xff] %v1316_v40  ;;  %v1222_v41 = vpop.f32.mrb[7].mxu0  ;;  %v1318_v45 = vpop.f32.mrb[7].mxu1 }
 0x608   : >> { %1403 = vst [vmem:[%s3002_s19 + $0x38] sm:$0xff] %v1222_v41  ;;  %1435 = vst [vmem:[%s3002_s19 + $0x138] sm:$0xff] %v1318_v45 }
 0x60a   : >> { %v1226_v46 = vpop.f32.mrb[8].mxu0  ;;  %v1322_v58 = vpop.f32.mrb[8].mxu1 }
 0x60b   : >> { %1404 = vst [vmem:[%s3002_s19 + $0x40] sm:$0xff] %v1226_v46  ;;  %1436 = vst [vmem:[%s3002_s19 + $0x140] sm:$0xff] %v1322_v58  ;;  %v1228_v59 = vpop.f32.mrb[9].mxu0  ;;  %v1324_v60 = vpop.f32.mrb[9].mxu1 }
 0x60c   : >> { %1405 = vst [vmem:[%s3002_s19 + $0x48] sm:$0xff] %v1228_v59  ;;  %1437 = vst [vmem:[%s3002_s19 + $0x148] sm:$0xff] %v1324_v60 }
 0x60e   : >> { %v1232_v61 = vpop.f32.mrb[10].mxu0  ;;  %v1328_v62 = vpop.f32.mrb[10].mxu1 }
 0x60f   : >> { %1406 = vst [vmem:[%s3002_s19 + $0x50] sm:$0xff] %v1232_v61  ;;  %1438 = vst [vmem:[%s3002_s19 + $0x150] sm:$0xff] %v1328_v62  ;;  %v1234_v47 = vpop.f32.mrb[11].mxu0  ;;  %v1330_v50 = vpop.f32.mrb[11].mxu1 }
 0x610   : >> { %1407 = vst [vmem:[%s3002_s19 + $0x58] sm:$0xff] %v1234_v47  ;;  %1439 = vst [vmem:[%s3002_s19 + $0x158] sm:$0xff] %v1330_v50 }
 0x612   : >> { %v1238_v51 = vpop.f32.mrb[12].mxu0  ;;  %v1334_v52 = vpop.f32.mrb[12].mxu1 }
 0x613   : >> { %1408 = vst [vmem:[%s3002_s19 + $0x60] sm:$0xff] %v1238_v51  ;;  %1440 = vst [vmem:[%s3002_s19 + $0x160] sm:$0xff] %v1334_v52  ;;  %v1240_v53 = vpop.f32.mrb[13].mxu0  ;;  %v1336_v48 = vpop.f32.mrb[13].mxu1 }
 0x614   : >> { %1409 = vst [vmem:[%s3002_s19 + $0x68] sm:$0xff] %v1240_v53  ;;  %1441 = vst [vmem:[%s3002_s19 + $0x168] sm:$0xff] %v1336_v48 }
 0x616   : >> { %v1244_v9 = vpop.f32.mrb[14].mxu0  ;;  %v1340_v49 = vpop.f32.mrb[14].mxu1 }
 0x617   : >> { %1410 = vst [vmem:[%s3002_s19 + $0x70] sm:$0xff] %v1244_v9  ;;  %1442 = vst [vmem:[%s3002_s19 + $0x170] sm:$0xff] %v1340_v49  ;;  %v1246_v13 = vpop.f32.mrb[15].mxu0  ;;  %v1342_v54 = vpop.f32.mrb[15].mxu1 }
 0x618   : >> { %1411 = vst [vmem:[%s3002_s19 + $0x78] sm:$0xff] %v1246_v13  ;;  %1443 = vst [vmem:[%s3002_s19 + $0x178] sm:$0xff] %v1342_v54 }
 0x61a   : >> { %v1250_v55 = vpop.f32.mrb[16].mxu0  ;;  %v1346_v56 = vpop.f32.mrb[16].mxu1 }
 0x61b   : >> { %1412 = vst [vmem:[%s3002_s19 + $0x80] sm:$0xff] %v1250_v55  ;;  %1444 = vst [vmem:[%s3002_s19 + $0x180] sm:$0xff] %v1346_v56  ;;  %v1252_v63 = vpop.f32.mrb[17].mxu0  ;;  %v1348_v0 = vpop.f32.mrb[17].mxu1 }
 0x61c   : >> { %1413 = vst [vmem:[%s3002_s19 + $0x88] sm:$0xff] %v1252_v63  ;;  %1445 = vst [vmem:[%s3002_s19 + $0x188] sm:$0xff] %v1348_v0 }
 0x61e   : >> { %v1256_v1 = vpop.f32.mrb[18].mxu0  ;;  %v1352_v2 = vpop.f32.mrb[18].mxu1 }
 0x61f   : >> { %1414 = vst [vmem:[%s3002_s19 + $0x90] sm:$0xff] %v1256_v1  ;;  %1446 = vst [vmem:[%s3002_s19 + $0x190] sm:$0xff] %v1352_v2  ;;  %v1258_v3 = vpop.f32.mrb[19].mxu0  ;;  %v1354_v4 = vpop.f32.mrb[19].mxu1 }
 0x620   : >> { %1415 = vst [vmem:[%s3002_s19 + $0x98] sm:$0xff] %v1258_v3  ;;  %1447 = vst [vmem:[%s3002_s19 + $0x198] sm:$0xff] %v1354_v4 }
 0x622   : >> { %v1262_v5 = vpop.f32.mrb[20].mxu0  ;;  %v1358_v6 = vpop.f32.mrb[20].mxu1 }
 0x623   : >> { %1416 = vst [vmem:[%s3002_s19 + $0xa0] sm:$0xff] %v1262_v5  ;;  %1448 = vst [vmem:[%s3002_s19 + $0x1a0] sm:$0xff] %v1358_v6  ;;  %v1264_v7 = vpop.f32.mrb[21].mxu0  ;;  %v1360_v8 = vpop.f32.mrb[21].mxu1 }
 0x624   : >> { %1417 = vst [vmem:[%s3002_s19 + $0xa8] sm:$0xff] %v1264_v7  ;;  %1449 = vst [vmem:[%s3002_s19 + $0x1a8] sm:$0xff] %v1360_v8 }
 0x626   : >> { %v1268_v10 = vpop.f32.mrb[22].mxu0  ;;  %v1364_v11 = vpop.f32.mrb[22].mxu1 }
 0x627   : >> { %1418 = vst [vmem:[%s3002_s19 + $0xb0] sm:$0xff] %v1268_v10  ;;  %1450 = vst [vmem:[%s3002_s19 + $0x1b0] sm:$0xff] %v1364_v11  ;;  %v1270_v12 = vpop.f32.mrb[23].mxu0  ;;  %v1366_v14 = vpop.f32.mrb[23].mxu1 }
 0x628   : >> { %1419 = vst [vmem:[%s3002_s19 + $0xb8] sm:$0xff] %v1270_v12  ;;  %1451 = vst [vmem:[%s3002_s19 + $0x1b8] sm:$0xff] %v1366_v14 }
 0x62a   : >> { %v1274_v15 = vpop.f32.mrb[24].mxu0  ;;  %v1370_v16 = vpop.f32.mrb[24].mxu1 }
 0x62b   : >> { %1420 = vst [vmem:[%s3002_s19 + $0xc0] sm:$0xff] %v1274_v15  ;;  %1452 = vst [vmem:[%s3002_s19 + $0x1c0] sm:$0xff] %v1370_v16  ;;  %v1276_v17 = vpop.f32.mrb[25].mxu0  ;;  %v1372_v18 = vpop.f32.mrb[25].mxu1 }
 0x62c   : >> { %1421 = vst [vmem:[%s3002_s19 + $0xc8] sm:$0xff] %v1276_v17  ;;  %1453 = vst [vmem:[%s3002_s19 + $0x1c8] sm:$0xff] %v1372_v18 }
 0x62e   : >> { %v1280_v19 = vpop.f32.mrb[26].mxu0  ;;  %v1376_v20 = vpop.f32.mrb[26].mxu1 }
 0x62f   : >> { %1422 = vst [vmem:[%s3002_s19 + $0xd0] sm:$0xff] %v1280_v19  ;;  %1454 = vst [vmem:[%s3002_s19 + $0x1d0] sm:$0xff] %v1376_v20  ;;  %v1282_v21 = vpop.f32.mrb[27].mxu0  ;;  %v1378_v22 = vpop.f32.mrb[27].mxu1 }
 0x630   : >> { %1423 = vst [vmem:[%s3002_s19 + $0xd8] sm:$0xff] %v1282_v21  ;;  %1455 = vst [vmem:[%s3002_s19 + $0x1d8] sm:$0xff] %v1378_v22 }
 0x632   : >> { %v1286_v23 = vpop.f32.mrb[28].mxu0  ;;  %v1382_v24 = vpop.f32.mrb[28].mxu1 }
 0x633   : >> { %1424 = vst [vmem:[%s3002_s19 + $0xe0] sm:$0xff] %v1286_v23  ;;  %1456 = vst [vmem:[%s3002_s19 + $0x1e0] sm:$0xff] %v1382_v24  ;;  %v1288_v25 = vpop.f32.mrb[29].mxu0  ;;  %v1384_v26 = vpop.f32.mrb[29].mxu1 }
 0x634   : >> { %1425 = vst [vmem:[%s3002_s19 + $0xe8] sm:$0xff] %v1288_v25  ;;  %1457 = vst [vmem:[%s3002_s19 + $0x1e8] sm:$0xff] %v1384_v26 }
 0x636   : >> { %v1292_v27 = vpop.f32.mrb[30].mxu0  ;;  %v1388_v28 = vpop.f32.mrb[30].mxu1 }
 0x637   : >> { %1426 = vst [vmem:[%s3002_s19 + $0xf0] sm:$0xff] %v1292_v27  ;;  %1458 = vst [vmem:[%s3002_s19 + $0x1f0] sm:$0xff] %v1388_v28  ;;  %v1294_v57 = vpop.f32.mrb[31].mxu0  ;;  %v1390_v29 = vpop.f32.mrb[31].mxu1 }
 0x638   : >> { %1427 = vst [vmem:[%s3002_s19 + $0xf8] sm:$0xff] %v1294_v57  ;;  %1459 = vst [vmem:[%s3002_s19 + $0x1f8] sm:$0xff] %v1390_v29 }
 0x639 PF: >> { %s768_s16 = sadd.s32 1, %s2499_s16  }
 0x63a   : >> { %p765_p3 = scmp.ge.s32.totalorder %s768_s16, 3  }
 0x63b   : > { %p3313_p5 = scmp.ne.s32.totalorder (%p765_p3), %s3301_s12, 0 }
 0x63c   : > { %767 = sbr.rel (!%p765_p3) target bundleno = 734 (0x2de), region = 142 }
 0x643   : > { %1466 = sbr.rel (!%p3313_p5) target bundleno = 1682 (0x692), region = 75  ;;  %s1468_s20 = ssub.s32 (%p3313_p5), 5, %s769_s22 }
 0x644   : > { %s1899_s23 = smul.u32 (%p3313_p5), 1536, %s2603_s29  ;;  %p1469_p6 = scmp.lt.s32.totalorder (%p3313_p5), %s1468_s20, 3 }
 0x646   : > { %s3079_s7 = scalar_lea.vmem (%p3313_p5), %s3294_s6, %s1899_s23  }
 0x64a   : > { %s3326_s20 = smov (!%p1469_p6, %s1468_s20), 3 }
 0x64b   : > { %s1893_s21 = sshll.u32 %s3326_s20, 13  ;;  %s1874_s13 = sshll.u32 %s3326_s20, 5 }
 0x64c   : > { %p1875_p10 = scmp.eq.s32.totalorder %s1893_s21, 0 }
 0x64d   : > { %s3087_s12 = sshrl.u32 (!%p1875_p10), %s1874_s13, 5 }
 0x64e   : > { %1481 = sbr.rel (%p1875_p10) target bundleno = 1682 (0x692), region = 79  ;;  %p1876_p9 = scmp.le.s32.totalorder (!%p1875_p10), %s3087_s12, 0 }
 0x655   : > { %1723 = sbr.rel (%p1876_p9) target bundleno = 1661 (0x67d), region = 147  ;;  %s3314_s29 = smov (!%p1876_p9), %s3079_s7 }
 0x656   : > { %s3315_s17 = smov (!%p1876_p9), %s2875_s11  ;;  %s3096_s16 = smov (!%p1876_p9), 0  }
 0x657   : > { %s3098_s22 = smov (!%p1876_p9), 0  }
 0x65c LB: >> { %v1494_v37 = vld [vmem:[%s2507_s17] sm:$0xff]  ;;  %v1496_v42 = vld [vmem:[%s2507_s17 + $0x10] sm:$0xff]  ;;  %s1622_s25 = sadd.s32 1, %s2511_s16  ;;  %v1558_v55 = vld [vmem:[%s2507_s17 + $0x8] sm:$0xff]  ;;  %s1488_s22 = sadd.s32 1, %s2515_s22   ;;  %s2515_s22 = sphi %s3098_s22, %s1488_s22   ;;  %s2511_s16 = sphi %s3096_s16, %s3318_s16   ;;  %s2507_s17 = sphi %s3315_s17, %s3317_s17   ;;  %s2503_s29 = sphi %s3314_s29, %s3316_s29  }
 0x65d   : >> { %v1498_v43 = vld [vmem:[%s2507_s17 + $0x20] sm:$0xff]  ;;  %1495 = vst [vmem:[%s2503_s29] sm:$0xff] %v1494_v37  ;;  %1497 = vst [vmem:[%s2503_s29 + $0x10] sm:$0xff] %v1496_v42  ;;  %v1500_v44 = vld [vmem:[%s2507_s17 + $0x30] sm:$0xff]  ;;  %p1623_p13 = scmp.ge.s32.totalorder %s1622_s25, %s3087_s12  ;;  %p1487_p2 = scmp.ge.s32.totalorder %s1488_s22, %s3087_s12 }
 0x65e   : >> { %1499 = vst [vmem:[%s2503_s29 + $0x20] sm:$0xff] %v1498_v43  ;;  %v1502_v30 = vld [vmem:[%s2507_s17 + $0x40] sm:$0xff]  ;;  %v1504_v31 = vld [vmem:[%s2507_s17 + $0x50] sm:$0xff]  ;;  %1501 = vst [vmem:[%s2503_s29 + $0x30] sm:$0xff] %v1500_v44 }
 0x65f   : >> { %1503 = vst [vmem:[%s2503_s29 + $0x40] sm:$0xff] %v1502_v30  ;;  %1505 = vst [vmem:[%s2503_s29 + $0x50] sm:$0xff] %v1504_v31  ;;  %v1506_v32 = vld [vmem:[%s2507_s17 + $0x60] sm:$0xff]  ;;  %v1508_v33 = vld [vmem:[%s2507_s17 + $0x70] sm:$0xff]  ;;  %s3328_s25 = smov (%p1623_p13, %s1622_s25), 0 }
 0x660   : >> { %v1510_v34 = vld [vmem:[%s2507_s17 + $0x80] sm:$0xff]  ;;  %1507 = vst [vmem:[%s2503_s29 + $0x60] sm:$0xff] %v1506_v32  ;;  %1509 = vst [vmem:[%s2503_s29 + $0x70] sm:$0xff] %v1508_v33  ;;  %v1512_v35 = vld [vmem:[%s2507_s17 + $0x90] sm:$0xff]  ;;  %s1877_s15 = sshll.u32 %s3328_s25, 9  ;;  %s3318_s16 = smov %s3328_s25 }
 0x661   : >> { %1511 = vst [vmem:[%s2503_s29 + $0x80] sm:$0xff] %v1510_v34  ;;  %v1514_v36 = vld [vmem:[%s2507_s17 + $0xa0] sm:$0xff]  ;;  %v1516_v38 = vld [vmem:[%s2507_s17 + $0xb0] sm:$0xff]  ;;  %1513 = vst [vmem:[%s2503_s29 + $0x90] sm:$0xff] %v1512_v35  ;;  %s3154_s18 = scalar_lea.vmem %s2875_s11, %s1877_s15 [#allocation13]   ;;  %s3157_s28 = scalar_lea.vmem %s3079_s7, %s1877_s15  }
 0x662   : >> { %1515 = vst [vmem:[%s2503_s29 + $0xa0] sm:$0xff] %v1514_v36  ;;  %1517 = vst [vmem:[%s2503_s29 + $0xb0] sm:$0xff] %v1516_v38  ;;  %v1518_v39 = vld [vmem:[%s2507_s17 + $0xc0] sm:$0xff]  ;;  %v1520_v40 = vld [vmem:[%s2507_s17 + $0xd0] sm:$0xff] }
 0x663   : >> { %v1522_v41 = vld [vmem:[%s2507_s17 + $0xe0] sm:$0xff]  ;;  %1519 = vst [vmem:[%s2503_s29 + $0xc0] sm:$0xff] %v1518_v39  ;;  %1521 = vst [vmem:[%s2503_s29 + $0xd0] sm:$0xff] %v1520_v40  ;;  %v1524_v45 = vld [vmem:[%s2507_s17 + $0xf0] sm:$0xff] }
 0x664   : >> { %1523 = vst [vmem:[%s2503_s29 + $0xe0] sm:$0xff] %v1522_v41  ;;  %v1526_v46 = vld [vmem:[%s2507_s17 + $0x100] sm:$0xff]  ;;  %v1528_v58 = vld [vmem:[%s2507_s17 + $0x110] sm:$0xff]  ;;  %1525 = vst [vmem:[%s2503_s29 + $0xf0] sm:$0xff] %v1524_v45 }
 0x665   : >> { %1527 = vst [vmem:[%s2503_s29 + $0x100] sm:$0xff] %v1526_v46  ;;  %1529 = vst [vmem:[%s2503_s29 + $0x110] sm:$0xff] %v1528_v58  ;;  %v1530_v59 = vld [vmem:[%s2507_s17 + $0x120] sm:$0xff]  ;;  %v1532_v60 = vld [vmem:[%s2507_s17 + $0x130] sm:$0xff] }
 0x666   : >> { %v1534_v61 = vld [vmem:[%s2507_s17 + $0x140] sm:$0xff]  ;;  %1531 = vst [vmem:[%s2503_s29 + $0x120] sm:$0xff] %v1530_v59  ;;  %1533 = vst [vmem:[%s2503_s29 + $0x130] sm:$0xff] %v1532_v60  ;;  %v1536_v62 = vld [vmem:[%s2507_s17 + $0x150] sm:$0xff] }
 0x667   : >> { %1535 = vst [vmem:[%s2503_s29 + $0x140] sm:$0xff] %v1534_v61  ;;  %v1538_v47 = vld [vmem:[%s2507_s17 + $0x160] sm:$0xff]  ;;  %v1540_v50 = vld [vmem:[%s2507_s17 + $0x170] sm:$0xff]  ;;  %1537 = vst [vmem:[%s2503_s29 + $0x150] sm:$0xff] %v1536_v62 }
 0x668   : >> { %1539 = vst [vmem:[%s2503_s29 + $0x160] sm:$0xff] %v1538_v47  ;;  %1541 = vst [vmem:[%s2503_s29 + $0x170] sm:$0xff] %v1540_v50  ;;  %v1542_v51 = vld [vmem:[%s2507_s17 + $0x180] sm:$0xff]  ;;  %v1544_v52 = vld [vmem:[%s2507_s17 + $0x190] sm:$0xff] }
 0x669   : >> { %v1546_v53 = vld [vmem:[%s2507_s17 + $0x1a0] sm:$0xff]  ;;  %1543 = vst [vmem:[%s2503_s29 + $0x180] sm:$0xff] %v1542_v51  ;;  %1545 = vst [vmem:[%s2503_s29 + $0x190] sm:$0xff] %v1544_v52  ;;  %v1548_v48 = vld [vmem:[%s2507_s17 + $0x1b0] sm:$0xff] }
 0x66a   : >> { %1547 = vst [vmem:[%s2503_s29 + $0x1a0] sm:$0xff] %v1546_v53  ;;  %v1550_v9 = vld [vmem:[%s2507_s17 + $0x1c0] sm:$0xff]  ;;  %v1552_v49 = vld [vmem:[%s2507_s17 + $0x1d0] sm:$0xff]  ;;  %1549 = vst [vmem:[%s2503_s29 + $0x1b0] sm:$0xff] %v1548_v48 }
 0x66b   : >> { %1551 = vst [vmem:[%s2503_s29 + $0x1c0] sm:$0xff] %v1550_v9  ;;  %1553 = vst [vmem:[%s2503_s29 + $0x1d0] sm:$0xff] %v1552_v49  ;;  %v1554_v13 = vld [vmem:[%s2507_s17 + $0x1e0] sm:$0xff]  ;;  %v1556_v54 = vld [vmem:[%s2507_s17 + $0x1f0] sm:$0xff] }
 0x66c   : >> { %1555 = vst [vmem:[%s2503_s29 + $0x1e0] sm:$0xff] %v1554_v13  ;;  %1557 = vst [vmem:[%s2503_s29 + $0x1f0] sm:$0xff] %v1556_v54  ;;  %v1560_v56 = vld [vmem:[%s2507_s17 + $0x18] sm:$0xff]  ;;  %v1562_v63 = vld [vmem:[%s2507_s17 + $0x28] sm:$0xff] }
 0x66d   : >> { %1559 = vst [vmem:[%s2503_s29 + $0x8] sm:$0xff] %v1558_v55  ;;  %v1564_v0 = vld [vmem:[%s2507_s17 + $0x38] sm:$0xff]  ;;  %1561 = vst [vmem:[%s2503_s29 + $0x18] sm:$0xff] %v1560_v56  ;;  %v1566_v1 = vld [vmem:[%s2507_s17 + $0x48] sm:$0xff] }
 0x66e   : >> { %1563 = vst [vmem:[%s2503_s29 + $0x28] sm:$0xff] %v1562_v63  ;;  %1565 = vst [vmem:[%s2503_s29 + $0x38] sm:$0xff] %v1564_v0  ;;  %v1568_v2 = vld [vmem:[%s2507_s17 + $0x58] sm:$0xff]  ;;  %v1570_v3 = vld [vmem:[%s2507_s17 + $0x68] sm:$0xff] }
 0x66f   : >> { %1567 = vst [vmem:[%s2503_s29 + $0x48] sm:$0xff] %v1566_v1  ;;  %1569 = vst [vmem:[%s2503_s29 + $0x58] sm:$0xff] %v1568_v2  ;;  %v1572_v4 = vld [vmem:[%s2507_s17 + $0x78] sm:$0xff]  ;;  %v1574_v5 = vld [vmem:[%s2507_s17 + $0x88] sm:$0xff] }
 0x670   : >> { %1571 = vst [vmem:[%s2503_s29 + $0x68] sm:$0xff] %v1570_v3  ;;  %v1576_v6 = vld [vmem:[%s2507_s17 + $0x98] sm:$0xff]  ;;  %1573 = vst [vmem:[%s2503_s29 + $0x78] sm:$0xff] %v1572_v4  ;;  %v1578_v7 = vld [vmem:[%s2507_s17 + $0xa8] sm:$0xff] }
 0x671   : >> { %1575 = vst [vmem:[%s2503_s29 + $0x88] sm:$0xff] %v1574_v5  ;;  %1577 = vst [vmem:[%s2503_s29 + $0x98] sm:$0xff] %v1576_v6  ;;  %v1580_v8 = vld [vmem:[%s2507_s17 + $0xb8] sm:$0xff]  ;;  %v1582_v10 = vld [vmem:[%s2507_s17 + $0xc8] sm:$0xff] }
 0x672   : >> { %1579 = vst [vmem:[%s2503_s29 + $0xa8] sm:$0xff] %v1578_v7  ;;  %1581 = vst [vmem:[%s2503_s29 + $0xb8] sm:$0xff] %v1580_v8  ;;  %v1584_v11 = vld [vmem:[%s2507_s17 + $0xd8] sm:$0xff]  ;;  %v1586_v12 = vld [vmem:[%s2507_s17 + $0xe8] sm:$0xff] }
 0x673   : >> { %1583 = vst [vmem:[%s2503_s29 + $0xc8] sm:$0xff] %v1582_v10  ;;  %v1588_v14 = vld [vmem:[%s2507_s17 + $0xf8] sm:$0xff]  ;;  %1585 = vst [vmem:[%s2503_s29 + $0xd8] sm:$0xff] %v1584_v11  ;;  %v1590_v15 = vld [vmem:[%s2507_s17 + $0x108] sm:$0xff] }
 0x674   : >> { %1587 = vst [vmem:[%s2503_s29 + $0xe8] sm:$0xff] %v1586_v12  ;;  %1589 = vst [vmem:[%s2503_s29 + $0xf8] sm:$0xff] %v1588_v14  ;;  %v1592_v16 = vld [vmem:[%s2507_s17 + $0x118] sm:$0xff]  ;;  %v1594_v17 = vld [vmem:[%s2507_s17 + $0x128] sm:$0xff] }
 0x675   : >> { %1591 = vst [vmem:[%s2503_s29 + $0x108] sm:$0xff] %v1590_v15  ;;  %1593 = vst [vmem:[%s2503_s29 + $0x118] sm:$0xff] %v1592_v16  ;;  %v1596_v18 = vld [vmem:[%s2507_s17 + $0x138] sm:$0xff]  ;;  %v1598_v19 = vld [vmem:[%s2507_s17 + $0x148] sm:$0xff] }
 0x676   : >> { %1595 = vst [vmem:[%s2503_s29 + $0x128] sm:$0xff] %v1594_v17  ;;  %v1600_v20 = vld [vmem:[%s2507_s17 + $0x158] sm:$0xff]  ;;  %1597 = vst [vmem:[%s2503_s29 + $0x138] sm:$0xff] %v1596_v18  ;;  %v1602_v21 = vld [vmem:[%s2507_s17 + $0x168] sm:$0xff]  ;;  %1490 = sbr.rel (!%p1487_p2) target bundleno = 1628 (0x65c), region = 153 }
 0x677   : >> { %1599 = vst [vmem:[%s2503_s29 + $0x148] sm:$0xff] %v1598_v19  ;;  %1601 = vst [vmem:[%s2503_s29 + $0x158] sm:$0xff] %v1600_v20  ;;  %v1604_v22 = vld [vmem:[%s2507_s17 + $0x178] sm:$0xff]  ;;  %v1606_v23 = vld [vmem:[%s2507_s17 + $0x188] sm:$0xff] }
 0x678   : >> { %1603 = vst [vmem:[%s2503_s29 + $0x168] sm:$0xff] %v1602_v21  ;;  %1605 = vst [vmem:[%s2503_s29 + $0x178] sm:$0xff] %v1604_v22  ;;  %v1608_v24 = vld [vmem:[%s2507_s17 + $0x198] sm:$0xff]  ;;  %v1610_v25 = vld [vmem:[%s2507_s17 + $0x1a8] sm:$0xff] }
 0x679   : >> { %1607 = vst [vmem:[%s2503_s29 + $0x188] sm:$0xff] %v1606_v23  ;;  %v1612_v26 = vld [vmem:[%s2507_s17 + $0x1b8] sm:$0xff]  ;;  %1609 = vst [vmem:[%s2503_s29 + $0x198] sm:$0xff] %v1608_v24  ;;  %v1614_v27 = vld [vmem:[%s2507_s17 + $0x1c8] sm:$0xff] }
 0x67a   : >> { %1611 = vst [vmem:[%s2503_s29 + $0x1a8] sm:$0xff] %v1610_v25  ;;  %1613 = vst [vmem:[%s2503_s29 + $0x1b8] sm:$0xff] %v1612_v26  ;;  %v1616_v28 = vld [vmem:[%s2507_s17 + $0x1d8] sm:$0xff]  ;;  %v1618_v57 = vld [vmem:[%s2507_s17 + $0x1e8] sm:$0xff] }
 0x67b   : >> { %1615 = vst [vmem:[%s2503_s29 + $0x1c8] sm:$0xff] %v1614_v27  ;;  %1617 = vst [vmem:[%s2503_s29 + $0x1d8] sm:$0xff] %v1616_v28  ;;  %v1620_v29 = vld [vmem:[%s2507_s17 + $0x1f8] sm:$0xff]  ;;  %s3317_s17 = smov %s3154_s18 }
 0x67c   : >> { %1619 = vst [vmem:[%s2503_s29 + $0x1e8] sm:$0xff] %v1618_v57  ;;  %1621 = vst [vmem:[%s2503_s29 + $0x1f8] sm:$0xff] %v1620_v29  ;;  %s3316_s29 = smov %s3157_s28 }
 0x67d PF: > { %s3263_s8 = sand.u32 31, %s1874_s13   ;;  %s1896_s24 = sshll.u32 %s3087_s12, 9 }
 0x67e   : > { %s3267_s2 = scalar_lea.vmem %s2875_s11, %s1896_s24 [#allocation13]   ;;  %s1635_s14 = scalar_lea.vmem %s3079_s7, %s1896_s24  }
 0x67f   : > { %p1882_p1 = scmp.le.s32.totalorder %s3263_s8, 0 }
 0x680   : > { %s2517_s19 = smov (!%p1882_p1), %s1635_s14   ;;  %s2521_s23 = smov (!%p1882_p1), %s3267_s2  }
 0x681   : > { %1737 = sbr.rel (%p1882_p1) target bundleno = 1682 (0x692), region = 158  ;;  %s2525_s10 = smov (!%p1882_p1), 0  }
 0x682   : > { %s2529_s26 = smov (!%p1882_p1), 0  }
 0x688 LB: >> { %v1645_v37 = vld [vmem:[%s2523_s23] sm:$0xff]  ;;  %v1647_v42 = vld [vmem:[%s2523_s23 + $0x8] sm:$0xff]  ;;  %s1649_s11 = sadd.s32 1, %s2527_s10  ;;  %s1639_s26 = sadd.s32 1, %s2531_s26   ;;  %s2531_s26 = sphi %s2529_s26, %s1639_s26   ;;  %s2527_s10 = sphi %s2525_s10, %s2526_s10   ;;  %s2523_s23 = sphi %s2521_s23, %s1654_s23   ;;  %s2519_s19 = sphi %s2517_s19, %s1655_s19  }
 0x689   : >> { %1646 = vst [vmem:[%s2519_s19] sm:$0xff] %v1645_v37  ;;  %1648 = vst [vmem:[%s2519_s19 + $0x8] sm:$0xff] %v1647_v42  ;;  %p1650_p7 = scmp.ge.s32.totalorder %s1649_s11, %s3263_s8  ;;  %p1638_p4 = scmp.ge.s32.totalorder %s1639_s26, %s3263_s8 }
 0x68b   : >> { %s3330_s11 = smov (%p1650_p7, %s1649_s11), 0  ;;  %1641 = sbr.rel (!%p1638_p4) target bundleno = 1672 (0x688), region = 164 }
 0x68c   : >> { %s1883_s20 = sshll.u32 %s3330_s11, 4  ;;  %s2526_s10 = smov %s3330_s11  }
 0x68d   : >> { %s1654_s23 = scalar_lea.vmem %s3267_s2, %s1883_s20 [#allocation13]   ;;  %s1655_s19 = scalar_lea.vmem %s1635_s14, %s1883_s20  }
 0x692 PF: > { %p24_p8 = scmp.ge.s32.totalorder %s2606_s30, 4   ;;  %s3319_s26 = smov %s2487_s0 }
 0x693   : > { %s3320_s0 = smov %s2491_s27  ;;  %s3321_s27 = smov %s2616_s9 }
 0x694   : > { %s3322_s28 = smov %s2606_s30  ;;  %26 = sbr.rel (!%p24_p8) target bundleno = 20 (0x14), region = 175 }
 0x69b   :  { %1671 = vsyncpa [#allocation6], 1 }
 0x69c   :  { %1673 = vsyncpa [#allocation6 + $0x1], 1 }
 0x69d   :  { %1674 = vsyncpa [#allocation8], 1 }
 0x69e   :  { %1675 = vsyncpa [#allocation11], 1 }

</bundles_post_ra>
